<compile_context>
chip_gen: v7x
topology: tpu7x:2x2x1
jax: 0.10.0
libtpu: 0.0.40
codegen_flags: <defaults>
</compile_context>

<pallas_src>
import jax
import jax.numpy as jnp
from jax.experimental import pallas as pl
from jax.experimental.pallas import tpu as pltpu

HIDDEN = 512
LANE = 128
_NEG_BIG = -1e30  # finite "-inf" masking padded logit columns


def _round_up(x, m):
    return (x + m - 1) // m * m


def _cdiv(a, b):
    return (a + b - 1) // b


def _device_tile_policy():
    """Return (block_b, min_tiles) tuned per TPU generation.

    v5e: MXU-bound at tm=512 (1.75 us/tile >> 0.35 us step overhead), and f32
         h1/h2 temporaries scale with tm -> keep 512.
    v6e: ~2048-row tiles amortize per-grid-step overhead; ~18 MiB total VMEM is
         under the 32 MiB scoped default.
    v7x: same tile budget but require >= 2 tiles so both TensorCores get work.
    """
    try:
        kind = jax.devices()[0].device_kind.lower()
    except Exception:  # pragma: no cover - defensive
        kind = ""
    if "v5" in kind:
        return 512, 1
    if "v7" in kind:
        return 2048, 2
    return 2048, 1  # v6e / unknown default


def actor_kernel(x_ref, w1_ref, b1_ref, w2_ref, b2_ref, w3_ref, b3_ref, o_ref):
    # Layer 1: Linear + ReLU (bf16 MXU matmul, f32 accumulation).
    x = x_ref[...].astype(jnp.bfloat16)
    h1 = jnp.dot(x, w1_ref[...], preferred_element_type=jnp.float32) + b1_ref[...]
    h1 = jnp.maximum(h1, 0.0)

    # Layer 2: Linear + ReLU.
    h2 = jnp.dot(h1.astype(jnp.bfloat16), w2_ref[...],
                 preferred_element_type=jnp.float32) + b2_ref[...]
    h2 = jnp.maximum(h2, 0.0)

    # Layer 3: Linear + numerically-stable softmax over the lane-padded action
    # dim. Padded columns carry a -1e30 bias -> exp underflows to exactly 0.
    logits = jnp.dot(h2.astype(jnp.bfloat16), w3_ref[...],
                     preferred_element_type=jnp.float32) + b3_ref[...]
    m = jnp.max(logits, axis=-1, keepdims=True)
    e = jnp.exp(logits - m)
    denom = jnp.sum(e, axis=-1, keepdims=True)
    # Exact reciprocal: denom is only (tm, 1) values -> effectively free, and
    # rows sum to 1 within f32 rounding.
    o_ref[...] = (e * pl.reciprocal(denom, approx=False)).astype(o_ref.dtype)


def actor_forward(state, kernel_params, action_dim, *,
                  block_b=None, min_tiles=None,
                  out_dtype=jnp.float32, trim=True):
    """state: [B, state_dim] f32 -> action probabilities.

    kernel_params = (w1 bf16 [S,512], b1 f32 [1,512],
                     w2 bf16 [512,512], b2 f32 [1,512],
                     w3 bf16 [512,Npad], b3 f32 [1,Npad])  (Npad = action_dim
    rounded up to a multiple of 128, padded bias entries = -1e30).

    trim=True  -> returns [B, action_dim] (extra XLA slice pass; fine for small B).
    trim=False -> returns the padded [b_pad, Npad] block (no second pass over the
                  output; consumer indexes columns lazily).
    out_dtype=jnp.bfloat16 halves the output HBM store stream if acceptable.
    """
    w1, b1, w2, b2, w3, b3 = kernel_params
    B, state_dim = state.shape
    n_pad = w3.shape[1]

    if block_b is None or min_tiles is None:
        auto_b, auto_t = _device_tile_policy()
        block_b = auto_b if block_b is None else block_b
        min_tiles = auto_t if min_tiles is None else min_tiles

    # Bounded padding: split B into n_tiles roughly equal tiles (each <= block_b),
    # each a multiple of 8 sublanes.
    n_tiles = max(_cdiv(B, block_b), min_tiles)
    tm = max(_round_up(_cdiv(B, n_tiles), 8), 8)
    b_pad = tm * n_tiles
    if b_pad != B:
        state = jnp.pad(state, ((0, b_pad - B), (0, 0)))

    flops = 2 * b_pad * (state_dim * HIDDEN + HIDDEN * HIDDEN + HIDDEN * n_pad)
    bytes_accessed = (
        state.size * state.dtype.itemsize
        + sum(int(p.size) * p.dtype.itemsize for p in kernel_params)
        + b_pad * n_pad * jnp.dtype(out_dtype).itemsize
    )

    def build_call(single_buffer_weights):
        def resident(shape):
            # Constant index_map -> block never changes; single buffering frees
            # the dead second DMA buffer (VMEM headroom, esp. on v7x 64 MiB).
            if single_buffer_weights:
                return pl.BlockSpec(shape, lambda i: (0, 0),
                                    pipeline_mode=pl.Buffered(1))
            return pl.BlockSpec(shape, lambda i: (0, 0))

        return pl.pallas_call(
            actor_kernel,
            out_shape=jax.ShapeDtypeStruct((b_pad, n_pad), out_dtype),
            grid_spec=pltpu.PrefetchScalarGridSpec(
                num_scalar_prefetch=0,
                grid=(n_tiles,),
                in_specs=[
                    pl.BlockSpec((tm, state_dim), lambda i: (i, 0)),  # x tile
                    resident((state_dim, HIDDEN)),                    # w1
                    resident((1, HIDDEN)),                            # b1
                    resident((HIDDEN, HIDDEN)),                       # w2
                    resident((1, HIDDEN)),                            # b2
                    resident((HIDDEN, n_pad)),                        # w3 (padded)
                    resident((1, n_pad)),                             # b3 (padded)
                ],
                out_specs=pl.BlockSpec((tm, n_pad), lambda i: (i, 0)),
            ),
            compiler_params=pltpu.CompilerParams(
                # Megacore sharding of batch tiles on v7x; no-op on v5e/v6e.
                dimension_semantics=("parallel",),
            ),
            cost_estimate=pl.CostEstimate(
                flops=flops,
                transcendentals=b_pad * n_pad,
                bytes_accessed=bytes_accessed,
            ),
        )

    try:
        out = build_call(True)(state, w1, b1, w2, b2, w3, b3)
    except Exception:
        # Fallback for JAX builds that reject pipeline_mode / Buffered(1) on a
        # top-level BlockSpec: identical kernel, default double buffering.
        out = build_call(False)(state, w1, b1, w2, b2, w3, b3)

    if trim:
        return out[:B, :action_dim]
    return out


def init_actor_params(key, state_dim, action_dim, hidden=HIDDEN):
    """Deterministic synthetic f32 master params (shapes match nn.Linear)."""
    k1, k2, k3, k4, k5, k6 = jax.random.split(key, 6)
    # Stored as [in, out]; PyTorch's Linear.weight is the transpose.
    w1 = jax.random.normal(k1, (state_dim, hidden), jnp.float32) * 0.05
    b1 = jax.random.normal(k2, (1, hidden), jnp.float32) * 0.01
    w2 = jax.random.normal(k3, (hidden, hidden), jnp.float32) * 0.05
    b2 = jax.random.normal(k4, (1, hidden), jnp.float32) * 0.01
    w3 = jax.random.normal(k5, (hidden, action_dim), jnp.float32) * 0.05
    b3 = jax.random.normal(k6, (1, action_dim), jnp.float32) * 0.01
    return (w1, b1, w2, b2, w3, b3)


def prepare_kernel_params(params_f32, action_dim, lane=LANE):
    """bf16 weights, f32 biases; pad layer-3 to a lane-dense width."""
    w1, b1, w2, b2, w3, b3 = params_f32
    n_pad = _round_up(action_dim, lane)
    w3p = jnp.zeros((w3.shape[0], n_pad), jnp.float32).at[:, :action_dim].set(w3)
    b3p = jnp.full((1, n_pad), _NEG_BIG, jnp.float32).at[:, :action_dim].set(b3)
    return (
        w1.astype(jnp.bfloat16), b1,
        w2.astype(jnp.bfloat16), b2,
        w3p.astype(jnp.bfloat16), b3p,
    )


def actor_ref(state, params_f32):
    """Pure-JAX f32 reference for correctness check."""
    w1, b1, w2, b2, w3, b3 = params_f32
    h1 = jnp.maximum(state @ w1 + b1, 0.0)
    h2 = jnp.maximum(h1 @ w2 + b2, 0.0)
    return jax.nn.softmax(h2 @ w3 + b3, axis=-1)


if __name__ == "__main__":
    key = jax.random.PRNGKey(0)
    k_params, k_state = jax.random.split(key)

    batch = 2
    state_dim = 16
    action_dim = 6

    params_f32 = init_actor_params(k_params, state_dim, action_dim)
    kernel_params = prepare_kernel_params(params_f32, action_dim)
    state = jax.random.normal(k_state, (batch, state_dim), jnp.float32)

    out = actor_forward(state, kernel_params, action_dim)
    out = jax.block_until_ready(out)

    ref = actor_ref(state, params_f32)
    assert out.shape == (batch, action_dim)
    # Exact reciprocal -> rows normalize to 1 within f32 rounding.
    assert jnp.allclose(jnp.sum(out, axis=-1), 1.0, atol=1e-4)
    # Matches the f32 reference within bf16 weight precision.
    assert jnp.allclose(out, ref, atol=2e-2, rtol=2e-2)

    print("KERNEL_OK")
</pallas_src>

<mosaic_0001>
module attributes {stable_mosaic.version = 11 : i64} {
  func.func @actor_kernel(%arg0: i32, %arg1: memref<8x16xf32, #tpu.memory_space<vmem>>, %arg2: memref<16x512xbf16, #tpu.memory_space<vmem>>, %arg3: memref<1x512xf32, #tpu.memory_space<vmem>>, %arg4: memref<512x512xbf16, #tpu.memory_space<vmem>>, %arg5: memref<1x512xf32, #tpu.memory_space<vmem>>, %arg6: memref<512x128xbf16, #tpu.memory_space<vmem>>, %arg7: memref<1x128xf32, #tpu.memory_space<vmem>>, %arg8: memref<8x128xf32, #tpu.memory_space<vmem>>) attributes {dimension_semantics = [#tpu.dimension_semantics<parallel>], iteration_bounds = array<i64: 1>, scalar_prefetch = 0 : i64, scratch_operands = 0 : i64, tpu.core_type = #tpu.core_type<tc>, window_params = [{transform_indices = @transform_0, window_bounds = array<i64: 8, 16>}, {pipeline_mode = #tpu.pipeline_mode<synchronous>, transform_indices = @transform_1, window_bounds = array<i64: 16, 512>}, {pipeline_mode = #tpu.pipeline_mode<synchronous>, transform_indices = @transform_2, window_bounds = array<i64: 1, 512>}, {pipeline_mode = #tpu.pipeline_mode<synchronous>, transform_indices = @transform_3, window_bounds = array<i64: 512, 512>}, {pipeline_mode = #tpu.pipeline_mode<synchronous>, transform_indices = @transform_4, window_bounds = array<i64: 1, 512>}, {pipeline_mode = #tpu.pipeline_mode<synchronous>, transform_indices = @transform_5, window_bounds = array<i64: 512, 128>}, {pipeline_mode = #tpu.pipeline_mode<synchronous>, transform_indices = @transform_6, window_bounds = array<i64: 1, 128>}, {transform_indices = @transform_7, window_bounds = array<i64: 8, 128>}]} {
    %c0 = arith.constant 0 : index
    %c0_0 = arith.constant 0 : index
    %0 = vector.load %arg1[%c0, %c0_0] : memref<8x16xf32, #tpu.memory_space<vmem>>, vector<8x16xf32>
    %1 = arith.truncf %0 : vector<8x16xf32> to vector<8x16xbf16>
    %c0_1 = arith.constant 0 : index
    %c0_2 = arith.constant 0 : index
    %2 = vector.load %arg2[%c0_1, %c0_2] : memref<16x512xbf16, #tpu.memory_space<vmem>>, vector<16x512xbf16>
    %cst = arith.constant dense<0.000000e+00> : vector<8x512xf32>
    %3 = tpu.matmul %1, %2, %cst {dimension_numbers = #tpu.dot_dimension_numbers<[1], [0], [0], [1], [0, 0, 1, 1], [], []>} : vector<8x16xbf16>, vector<16x512xbf16>, vector<8x512xf32> -> vector<8x512xf32>
    %c0_3 = arith.constant 0 : index
    %c0_4 = arith.constant 0 : index
    %4 = vector.load %arg3[%c0_3, %c0_4] : memref<1x512xf32, #tpu.memory_space<vmem>>, vector<1x512xf32>
    %5 = vector.broadcast %4 : vector<1x512xf32> to vector<8x512xf32>
    %6 = arith.addf %3, %5 : vector<8x512xf32>
    %cst_5 = arith.constant 0.000000e+00 : f32
    %7 = vector.broadcast %cst_5 : f32 to vector<8x512xf32>
    %8 = arith.maximumf %6, %7 : vector<8x512xf32>
    %9 = arith.truncf %8 : vector<8x512xf32> to vector<8x512xbf16>
    %c0_6 = arith.constant 0 : index
    %c0_7 = arith.constant 0 : index
    %10 = vector.load %arg4[%c0_6, %c0_7] : memref<512x512xbf16, #tpu.memory_space<vmem>>, vector<512x512xbf16>
    %cst_8 = arith.constant dense<0.000000e+00> : vector<8x512xf32>
    %11 = tpu.matmul %9, %10, %cst_8 {dimension_numbers = #tpu.dot_dimension_numbers<[1], [0], [0], [1], [0, 0, 1, 1], [], []>} : vector<8x512xbf16>, vector<512x512xbf16>, vector<8x512xf32> -> vector<8x512xf32>
    %c0_9 = arith.constant 0 : index
    %c0_10 = arith.constant 0 : index
    %12 = vector.load %arg5[%c0_9, %c0_10] : memref<1x512xf32, #tpu.memory_space<vmem>>, vector<1x512xf32>
    %13 = vector.broadcast %12 : vector<1x512xf32> to vector<8x512xf32>
    %14 = arith.addf %11, %13 : vector<8x512xf32>
    %cst_11 = arith.constant 0.000000e+00 : f32
    %15 = vector.broadcast %cst_11 : f32 to vector<8x512xf32>
    %16 = arith.maximumf %14, %15 : vector<8x512xf32>
    %17 = arith.truncf %16 : vector<8x512xf32> to vector<8x512xbf16>
    %c0_12 = arith.constant 0 : index
    %c0_13 = arith.constant 0 : index
    %18 = vector.load %arg6[%c0_12, %c0_13] : memref<512x128xbf16, #tpu.memory_space<vmem>>, vector<512x128xbf16>
    %cst_14 = arith.constant dense<0.000000e+00> : vector<8x128xf32>
    %19 = tpu.matmul %17, %18, %cst_14 {dimension_numbers = #tpu.dot_dimension_numbers<[1], [0], [0], [1], [0, 0, 1, 1], [], []>} : vector<8x512xbf16>, vector<512x128xbf16>, vector<8x128xf32> -> vector<8x128xf32>
    %c0_15 = arith.constant 0 : index
    %c0_16 = arith.constant 0 : index
    %20 = vector.load %arg7[%c0_15, %c0_16] : memref<1x128xf32, #tpu.memory_space<vmem>>, vector<1x128xf32>
    %21 = vector.broadcast %20 : vector<1x128xf32> to vector<8x128xf32>
    %22 = arith.addf %19, %21 : vector<8x128xf32>
    %cst_17 = arith.constant dense<0xFF800000> : vector<8xf32>
    %23 = vector.multi_reduction <maximumf>, %22, %cst_17 [1] : vector<8x128xf32> to vector<8xf32>
    %24 = vector.shape_cast %23 : vector<8xf32> to vector<8x1xf32>
    %25 = vector.broadcast %24 : vector<8x1xf32> to vector<8x128xf32>
    %26 = arith.subf %22, %25 : vector<8x128xf32>
    %27 = math.exp %26 : vector<8x128xf32>
    %cst_18 = arith.constant dense<0.000000e+00> : vector<8xf32>
    %28 = vector.multi_reduction <add>, %27, %cst_18 [1] : vector<8x128xf32> to vector<8xf32>
    %29 = vector.shape_cast %28 : vector<8xf32> to vector<8x1xf32>
    %30 = tpu.reciprocal %29 : vector<8x1xf32> -> vector<8x1xf32>
    %31 = vector.broadcast %30 : vector<8x1xf32> to vector<8x128xf32>
    %32 = arith.mulf %27, %31 : vector<8x128xf32>
    %c0_19 = arith.constant 0 : index
    %c0_20 = arith.constant 0 : index
    %33 = vector.load %arg8[%c0_19, %c0_20] : memref<8x128xf32, #tpu.memory_space<vmem>>, vector<8x128xf32>
    tpu.vector_store %arg8[%c0_19, %c0_20], %32 {strides = array<i32>} : memref<8x128xf32, #tpu.memory_space<vmem>>, vector<8x128xf32>,
    return
  }
  func.func @transform_0(%arg0: i32) -> (i32, i32) {
    %c0_i32 = arith.constant 0 : i32
    %c0_i32_0 = arith.constant 0 : i32
    return %arg0, %c0_i32 : i32, i32
  }
  func.func @transform_1(%arg0: i32) -> (i32, i32) {
    %c0_i32 = arith.constant 0 : i32
    %c0_i32_0 = arith.constant 0 : i32
    %c0_i32_1 = arith.constant 0 : i32
    return %c0_i32, %c0_i32_0 : i32, i32
  }
  func.func @transform_2(%arg0: i32) -> (i32, i32) {
    %c0_i32 = arith.constant 0 : i32
    %c0_i32_0 = arith.constant 0 : i32
    %c0_i32_1 = arith.constant 0 : i32
    return %c0_i32, %c0_i32_0 : i32, i32
  }
  func.func @transform_3(%arg0: i32) -> (i32, i32) {
    %c0_i32 = arith.constant 0 : i32
    %c0_i32_0 = arith.constant 0 : i32
    %c0_i32_1 = arith.constant 0 : i32
    return %c0_i32, %c0_i32_0 : i32, i32
  }
  func.func @transform_4(%arg0: i32) -> (i32, i32) {
    %c0_i32 = arith.constant 0 : i32
    %c0_i32_0 = arith.constant 0 : i32
    %c0_i32_1 = arith.constant 0 : i32
    return %c0_i32, %c0_i32_0 : i32, i32
  }
  func.func @transform_5(%arg0: i32) -> (i32, i32) {
    %c0_i32 = arith.constant 0 : i32
    %c0_i32_0 = arith.constant 0 : i32
    %c0_i32_1 = arith.constant 0 : i32
    return %c0_i32, %c0_i32_0 : i32, i32
  }
  func.func @transform_6(%arg0: i32) -> (i32, i32) {
    %c0_i32 = arith.constant 0 : i32
    %c0_i32_0 = arith.constant 0 : i32
    %c0_i32_1 = arith.constant 0 : i32
    return %c0_i32, %c0_i32_0 : i32, i32
  }
  func.func @transform_7(%arg0: i32) -> (i32, i32) {
    %c0_i32 = arith.constant 0 : i32
    %c0_i32_0 = arith.constant 0 : i32
    return %arg0, %c0_i32 : i32, i32
  }
}

module attributes {stable_mosaic.version = 11 : i64} {
  func.func @actor_kernel(%arg0: i32, %arg1: memref<8x16xf32, #tpu.memory_space<vmem>>, %arg2: memref<16x512xbf16, #tpu.memory_space<vmem>>, %arg3: memref<1x512xf32, #tpu.memory_space<vmem>>, %arg4: memref<512x512xbf16, #tpu.memory_space<vmem>>, %arg5: memref<1x512xf32, #tpu.memory_space<vmem>>, %arg6: memref<512x128xbf16, #tpu.memory_space<vmem>>, %arg7: memref<1x128xf32, #tpu.memory_space<vmem>>, %arg8: memref<8x128xf32, #tpu.memory_space<vmem>>) attributes {dimension_semantics = [#tpu.dimension_semantics<parallel>], iteration_bounds = array<i64: 1>, scalar_prefetch = 0 : i64, scratch_operands = 0 : i64, tpu.core_type = #tpu.core_type<tc>, window_params = [{transform_indices = @transform_0, window_bounds = array<i64: 8, 16>}, {pipeline_mode = #tpu.pipeline_mode<synchronous>, transform_indices = @transform_1, window_bounds = array<i64: 16, 512>}, {pipeline_mode = #tpu.pipeline_mode<synchronous>, transform_indices = @transform_2, window_bounds = array<i64: 1, 512>}, {pipeline_mode = #tpu.pipeline_mode<synchronous>, transform_indices = @transform_3, window_bounds = array<i64: 512, 512>}, {pipeline_mode = #tpu.pipeline_mode<synchronous>, transform_indices = @transform_4, window_bounds = array<i64: 1, 512>}, {pipeline_mode = #tpu.pipeline_mode<synchronous>, transform_indices = @transform_5, window_bounds = array<i64: 512, 128>}, {pipeline_mode = #tpu.pipeline_mode<synchronous>, transform_indices = @transform_6, window_bounds = array<i64: 1, 128>}, {transform_indices = @transform_7, window_bounds = array<i64: 8, 128>}]} {
    %c0 = arith.constant 0 : index
    %c0_0 = arith.constant 0 : index
    %0 = vector.load %arg1[%c0, %c0_0] : memref<8x16xf32, #tpu.memory_space<vmem>>, vector<8x16xf32>
    %1 = arith.truncf %0 : vector<8x16xf32> to vector<8x16xbf16>
    %c0_1 = arith.constant 0 : index
    %c0_2 = arith.constant 0 : index
    %2 = vector.load %arg2[%c0_1, %c0_2] : memref<16x512xbf16, #tpu.memory_space<vmem>>, vector<16x512xbf16>
    %cst = arith.constant dense<0.000000e+00> : vector<8x512xf32>
    %3 = tpu.matmul %1, %2, %cst {dimension_numbers = #tpu.dot_dimension_numbers<[1], [0], [0], [1], [0, 0, 1, 1], [], []>} : vector<8x16xbf16>, vector<16x512xbf16>, vector<8x512xf32> -> vector<8x512xf32>
    %c0_3 = arith.constant 0 : index
    %c0_4 = arith.constant 0 : index
    %4 = vector.load %arg3[%c0_3, %c0_4] : memref<1x512xf32, #tpu.memory_space<vmem>>, vector<1x512xf32>
    %5 = vector.broadcast %4 : vector<1x512xf32> to vector<8x512xf32>
    %6 = arith.addf %3, %5 : vector<8x512xf32>
    %cst_5 = arith.constant 0.000000e+00 : f32
    %7 = vector.broadcast %cst_5 : f32 to vector<8x512xf32>
    %8 = arith.maximumf %6, %7 : vector<8x512xf32>
    %9 = arith.truncf %8 : vector<8x512xf32> to vector<8x512xbf16>
    %c0_6 = arith.constant 0 : index
    %c0_7 = arith.constant 0 : index
    %10 = vector.load %arg4[%c0_6, %c0_7] : memref<512x512xbf16, #tpu.memory_space<vmem>>, vector<512x512xbf16>
    %cst_8 = arith.constant dense<0.000000e+00> : vector<8x512xf32>
    %11 = tpu.matmul %9, %10, %cst_8 {dimension_numbers = #tpu.dot_dimension_numbers<[1], [0], [0], [1], [0, 0, 1, 1], [], []>} : vector<8x512xbf16>, vector<512x512xbf16>, vector<8x512xf32> -> vector<8x512xf32>
    %c0_9 = arith.constant 0 : index
    %c0_10 = arith.constant 0 : index
    %12 = vector.load %arg5[%c0_9, %c0_10] : memref<1x512xf32, #tpu.memory_space<vmem>>, vector<1x512xf32>
    %13 = vector.broadcast %12 : vector<1x512xf32> to vector<8x512xf32>
    %14 = arith.addf %11, %13 : vector<8x512xf32>
    %cst_11 = arith.constant 0.000000e+00 : f32
    %15 = vector.broadcast %cst_11 : f32 to vector<8x512xf32>
    %16 = arith.maximumf %14, %15 : vector<8x512xf32>
    %17 = arith.truncf %16 : vector<8x512xf32> to vector<8x512xbf16>
    %c0_12 = arith.constant 0 : index
    %c0_13 = arith.constant 0 : index
    %18 = vector.load %arg6[%c0_12, %c0_13] : memref<512x128xbf16, #tpu.memory_space<vmem>>, vector<512x128xbf16>
    %cst_14 = arith.constant dense<0.000000e+00> : vector<8x128xf32>
    %19 = tpu.matmul %17, %18, %cst_14 {dimension_numbers = #tpu.dot_dimension_numbers<[1], [0], [0], [1], [0, 0, 1, 1], [], []>} : vector<8x512xbf16>, vector<512x128xbf16>, vector<8x128xf32> -> vector<8x128xf32>
    %c0_15 = arith.constant 0 : index
    %c0_16 = arith.constant 0 : index
    %20 = vector.load %arg7[%c0_15, %c0_16] : memref<1x128xf32, #tpu.memory_space<vmem>>, vector<1x128xf32>
    %21 = vector.broadcast %20 : vector<1x128xf32> to vector<8x128xf32>
    %22 = arith.addf %19, %21 : vector<8x128xf32>
    %cst_17 = arith.constant dense<0xFF800000> : vector<8xf32>
    %23 = vector.multi_reduction <maximumf>, %22, %cst_17 [1] : vector<8x128xf32> to vector<8xf32>
    %24 = vector.shape_cast %23 : vector<8xf32> to vector<8x1xf32>
    %25 = vector.broadcast %24 : vector<8x1xf32> to vector<8x128xf32>
    %26 = arith.subf %22, %25 : vector<8x128xf32>
    %27 = math.exp %26 : vector<8x128xf32>
    %cst_18 = arith.constant dense<0.000000e+00> : vector<8xf32>
    %28 = vector.multi_reduction <add>, %27, %cst_18 [1] : vector<8x128xf32> to vector<8xf32>
    %29 = vector.shape_cast %28 : vector<8xf32> to vector<8x1xf32>
    %30 = tpu.reciprocal %29 : vector<8x1xf32> -> vector<8x1xf32>
    %31 = vector.broadcast %30 : vector<8x1xf32> to vector<8x128xf32>
    %32 = arith.mulf %27, %31 : vector<8x128xf32>
    %c0_19 = arith.constant 0 : index
    %c0_20 = arith.constant 0 : index
    %33 = vector.load %arg8[%c0_19, %c0_20] : memref<8x128xf32, #tpu.memory_space<vmem>>, vector<8x128xf32>
    tpu.vector_store %arg8[%c0_19, %c0_20], %32 {strides = array<i32>} : memref<8x128xf32, #tpu.memory_space<vmem>>, vector<8x128xf32>,
    return
  }
  func.func @transform_0(%arg0: i32) -> (i32, i32) {
    %c0_i32 = arith.constant 0 : i32
    %c0_i32_0 = arith.constant 0 : i32
    return %arg0, %c0_i32 : i32, i32
  }
  func.func @transform_1(%arg0: i32) -> (i32, i32) {
    %c0_i32 = arith.constant 0 : i32
    %c0_i32_0 = arith.constant 0 : i32
    %c0_i32_1 = arith.constant 0 : i32
    return %c0_i32, %c0_i32_0 : i32, i32
  }
  func.func @transform_2(%arg0: i32) -> (i32, i32) {
    %c0_i32 = arith.constant 0 : i32
    %c0_i32_0 = arith.constant 0 : i32
    %c0_i32_1 = arith.constant 0 : i32
    return %c0_i32, %c0_i32_0 : i32, i32
  }
  func.func @transform_3(%arg0: i32) -> (i32, i32) {
    %c0_i32 = arith.constant 0 : i32
    %c0_i32_0 = arith.constant 0 : i32
    %c0_i32_1 = arith.constant 0 : i32
    return %c0_i32, %c0_i32_0 : i32, i32
  }
  func.func @transform_4(%arg0: i32) -> (i32, i32) {
    %c0_i32 = arith.constant 0 : i32
    %c0_i32_0 = arith.constant 0 : i32
    %c0_i32_1 = arith.constant 0 : i32
    return %c0_i32, %c0_i32_0 : i32, i32
  }
  func.func @transform_5(%arg0: i32) -> (i32, i32) {
    %c0_i32 = arith.constant 0 : i32
    %c0_i32_0 = arith.constant 0 : i32
    %c0_i32_1 = arith.constant 0 : i32
    return %c0_i32, %c0_i32_0 : i32, i32
  }
  func.func @transform_6(%arg0: i32) -> (i32, i32) {
    %c0_i32 = arith.constant 0 : i32
    %c0_i32_0 = arith.constant 0 : i32
    %c0_i32_1 = arith.constant 0 : i32
    return %c0_i32, %c0_i32_0 : i32, i32
  }
  func.func @transform_7(%arg0: i32) -> (i32, i32) {
    %c0_i32 = arith.constant 0 : i32
    %c0_i32_0 = arith.constant 0 : i32
    return %arg0, %c0_i32 : i32, i32
  }
}

</mosaic_0001>

<bundles_post_ra>
// kernel: tpu_custom_call.1
= control target key start
LH: loop header
LB: loop body
LE: loop exit
PB: predicated region body
PF: predicated region fallthrough
CT: control target
= control target key end

     0   :  { %12 = vsyncpa [#allocation3], 0  ;;  %s2296_s0 = inlined_call_operand.hbm [shape: f32[8,16], index: 0, kind: input, shape index: {}]   ;;  %s2297_s1 = inlined_call_operand.hbm [shape: bf16[16,512], index: 1, kind: input, shape index: {}]   ;;  %s2298_s2 = inlined_call_operand.vmem [shape: f32[1,512], index: 2, kind: input, shape index: {}]   ;;  %s2299_s3 = inlined_call_operand.hbm [shape: bf16[512,512], index: 3, kind: input, shape index: {}]   ;;  %s2300_s4 = inlined_call_operand.vmem [shape: f32[1,512], index: 4, kind: input, shape index: {}]   ;;  %s2301_s5 = inlined_call_operand.hbm [shape: bf16[512,128], index: 5, kind: input, shape index: {}]   ;;  %s2302_s6 = inlined_call_operand.vmem [shape: f32[1,128], index: 6, kind: input, shape index: {}]   ;;  %s2303_s7 = inlined_call_operand.hbm [shape: f32[8,128], index: 7, kind: output, shape index: {}]  }
   0x1   :  { %13 = vsyncpa [#allocation6], 0 }
   0x2   :  { %14 = vsyncpa [#allocation9], 0 }
   0x3   :  { %15 = vsyncpa [#allocation4], 0  ;;  %s2140_s24 = smov [#allocation5]   ;;  %s2022_s28 = scalar_lea.hbm %s2297_s1, 512 }
   0x4   :  { %s31_s25 = sshll.u32 %s2140_s24, 4  ;;  %p2023_p0 = scmp.ne.s32.totalorder %s2297_s1, %s2022_s28  ;;  %s32_s25 = int_to_ptr.vmem [resolvable:$true] %s31_s25 }
   0x5   :  { %p2026_p1 = scmp.lt.u32.totalorder %s2022_s28, %s2297_s1 }
   0x7   :  { %p2028_p2 = pnand %p2026_p1, %p2023_p0 }
   0x9   :  { %2031 = shalt.err (!%p2028_p2)
}
   0xa   :  { %s2032_s10 = scalar_lea.vmem %s32_s25, 512  ;;  %p2037_p4 = scmp.lt.s32.totalorder %s32_s25, %s32_s25 }
   0xb   :  { %p2033_p3 = scmp.ne.s32.totalorder %s32_s25, %s2032_s10  ;;  %p2038_p5 = scmp.lt.s32.totalorder %s2032_s10, %s2032_s10 }
   0xd   :  { %p2039_p6 = por %p2038_p5, %p2037_p4 }
   0xf   :  { %p2040_p7 = pnand %p2039_p6, %p2033_p3 }
  0x11   :  { %2043 = shalt.err (!%p2040_p7)
}
  0x12   :  { %s2141_s11 = smov 256   ;;  %s2142_s12 = smov 16  }
  0x13   :  { %37 = dma.hbm_to_vmem [thread:$0]  %s2297_s1, 512, %s32_s25, [#allocation6], %s2141_s11, %s2141_s11, %s2142_s12  }
  0x14   :  { %s2143_s15 = smov [#allocation2]   ;;  %s2144_s17 = smov [#allocation7]  }
  0x15   :  { %s22_s16 = sshll.u32 %s2143_s15, 4  ;;  %s45_s18 = sshll.u32 %s2144_s17, 4  ;;  %s23_s16 = int_to_ptr.vmem [resolvable:$true] %s22_s16  ;;  %s46_s18 = int_to_ptr.vmem [resolvable:$true] %s45_s18 }
  0x16   :  { %s2044_s21 = scalar_lea.hbm %s2296_s0, 128 }
  0x17   :  { %p2045_p8 = scmp.ne.s32.totalorder %s2296_s0, %s2044_s21  ;;  %p2048_p9 = scmp.lt.u32.totalorder %s2044_s21, %s2296_s0 }
  0x19   :  { %p2050_p10 = pnand %p2048_p9, %p2045_p8 }
  0x1b   :  { %2053 = shalt.err (!%p2050_p10)
}
  0x1c   :  { %s2054_s1 = scalar_lea.vmem %s23_s16, 128  ;;  %p2059_p12 = scmp.lt.s32.totalorder %s23_s16, %s23_s16 }
  0x1d   :  { %p2055_p11 = scmp.ne.s32.totalorder %s23_s16, %s2054_s1  ;;  %p2060_p13 = scmp.lt.s32.totalorder %s2054_s1, %s2054_s1 }
  0x1f   :  { %p2061_p0 = por %p2060_p13, %p2059_p12 }
  0x21   :  { %p2062_p1 = pnand %p2061_p0, %p2055_p11 }
  0x23   :  { %2065 = shalt.err (!%p2062_p1)
}
  0x24   :  { %25 = dma.hbm_to_vmem [thread:$0]  %s2296_s0, 128, %s23_s16, [#allocation3]  }
  0x25   :  { %s2066_s30 = scalar_lea.hbm %s2299_s3, 16384 }
  0x26   :  { %p2067_p2 = scmp.ne.s32.totalorder %s2299_s3, %s2066_s30  ;;  %p2070_p3 = scmp.lt.u32.totalorder %s2066_s30, %s2299_s3 }
  0x28   :  { %p2072_p4 = pnand %p2070_p3, %p2067_p2 }
  0x2a   :  { %2075 = shalt.err (!%p2072_p4)
}
  0x2b   :  { %s2076_s14 = scalar_lea.vmem %s46_s18, 16384  ;;  %p2081_p6 = scmp.lt.s32.totalorder %s46_s18, %s46_s18 }
  0x2c   :  { %p2077_p5 = scmp.ne.s32.totalorder %s46_s18, %s2076_s14  ;;  %p2082_p7 = scmp.lt.s32.totalorder %s2076_s14, %s2076_s14 }
  0x2e   :  { %p2083_p8 = por %p2082_p7, %p2081_p6 }
  0x30   :  { %p2084_p9 = pnand %p2083_p8, %p2077_p5 }
  0x32   :  { %2087 = shalt.err (!%p2084_p9)
}
  0x33   :  { %51 = dma.hbm_to_vmem [thread:$0]  %s2299_s3, 16384, %s46_s18, [#allocation6], %s2141_s11, %s2141_s11, %s2142_s12  }
  0x34   :  { %s2145_s16 = smov [#allocation8]   ;;  %s2088_s21 = scalar_lea.hbm %s2301_s5, 4096 }
  0x35   :  { %s59_s17 = sshll.u32 %s2145_s16, 4  ;;  %p2089_p10 = scmp.ne.s32.totalorder %s2301_s5, %s2088_s21  ;;  %s60_s17 = int_to_ptr.vmem [resolvable:$true] %s59_s17 }
  0x36   :  { %p2092_p11 = scmp.lt.u32.totalorder %s2088_s21, %s2301_s5 }
  0x38   :  { %p2094_p12 = pnand %p2092_p11, %p2089_p10 }
  0x3a   :  { %2097 = shalt.err (!%p2094_p12)
}
  0x3b   :  { %s2098_s1 = scalar_lea.vmem %s60_s17, 4096  ;;  %p2103_p0 = scmp.lt.s32.totalorder %s60_s17, %s60_s17 }
  0x3c   :  { %p2099_p13 = scmp.ne.s32.totalorder %s60_s17, %s2098_s1  ;;  %p2104_p1 = scmp.lt.s32.totalorder %s2098_s1, %s2098_s1 }
  0x3e   :  { %p2105_p2 = por %p2104_p1, %p2103_p0 }
  0x40   :  { %p2106_p3 = pnand %p2105_p2, %p2099_p13 }
  0x42   :  { %2109 = shalt.err (!%p2106_p3)
}
  0x43   :  { %s2146_s3 = smov 64   ;;  %s2147_s11 = smov 4  }
  0x44   :  { %65 = dma.hbm_to_vmem [thread:$0]  %s2301_s5, 4096, %s60_s17, [#allocation9], %s2146_s3, %s2146_s3, %s2147_s11  }
  0x45   :  { %2132 = dma.done.wait [#allocation3], 128  }
  0x46   :  { %2133 = vsyncadd [#allocation3], 4294967168 }
  0x47   :  { %2134 = dma.done.wait [#allocation6], 16896  }
  0x48   :  { %2135 = vsyncadd [#allocation6], 4294950400 }
  0x49   :  { %2136 = dma.done.wait [#allocation9], 4096  }
  0x4a   :  { %2137 = vsyncadd [#allocation9], 4294963200  ;;  %v2148_v0 = vmov 0   ;;  %v1788_v1 = vld [vmem:[#allocation5 + $0x4] ss:$16 sps:$4 sm:$0xff]   ;;  %v81_v3 = vld [vmem:[#allocation2] sm:$0xff] }
  0x4b   :  { %165 = vmatprep.mubr.bf16.mxu0 %v2148_v0  ;;  %206 = vmatprep.mubr.bf16.mxu1 %v2148_v0  ;;  %v1790_v2 = vld [vmem:[#allocation5] ss:$16 sps:$4 sm:$0xff]   ;;  %v82_v4 = vpack.c.bf16 %v81_v3, %v81_v3  ;;  %v1791_v5 = vld [vmem:[#allocation5 + $0xc] ss:$16 sps:$4 sm:$0xff]   ;;  %v1793_v6 = vld [vmem:[#allocation5 + $0x8] ss:$16 sps:$4 sm:$0xff]  }
  0x4c   :  { %133 = vmatprep.subr.bf16.mxu0 %v1788_v1  ;;  %vm129_vm0 = vcmask 130048   ;;  %v1794_v7 = vld [vmem:[#allocation7] ss:$16 sps:$4 sm:$0xff]   ;;  %174 = vmatprep.subr.bf16.mxu1 %v1791_v5  ;;  %v1796_v8 = vld [vmem:[#allocation7 + $0x4] ss:$16 sps:$4 sm:$0xff]  }
  0x4d   :  { %134 = vmatpush1.bf16.msra.mxu0 %v1790_v2  ;;  %175 = vmatpush1.bf16.msra.mxu1 %v1793_v6  ;;  %v1797_v9 = vld [vmem:[#allocation7 + $0x8] ss:$16 sps:$4 sm:$0xff]   ;;  %v1799_v10 = vld [vmem:[#allocation7 + $0xc] ss:$16 sps:$4 sm:$0xff]   ;;  %v1802_v11 = vld [vmem:[#allocation7 + $0x24] ss:$16 sps:$4 sm:$0xff]  }
  0x4e   :  { %1013 = vmatprep.subr.bf16.mxu0 %v1796_v8  ;;  %1095 = vmatprep.subr.bf16.mxu1 %v1799_v10  ;;  %v1800_v12 = vld [vmem:[#allocation7 + $0x20] ss:$16 sps:$4 sm:$0xff]   ;;  %v1805_v13 = vld [vmem:[#allocation7 + $0x2c] ss:$16 sps:$4 sm:$0xff]   ;;  %v1803_v14 = vld [vmem:[#allocation7 + $0x28] ss:$16 sps:$4 sm:$0xff]  }
  0x4f   :  { %v1808_v15 = vld [vmem:[#allocation7 + $0x44] ss:$16 sps:$4 sm:$0xff]   ;;  %v1811_v16 = vld [vmem:[#allocation7 + $0x4c] ss:$16 sps:$4 sm:$0xff]   ;;  %v1806_v17 = vld [vmem:[#allocation7 + $0x40] ss:$16 sps:$4 sm:$0xff]  }
  0x50   :  { %1559 = vmatmul.mubr.msk.bf16.vlgmr.msra.gmra.mrb[0].mxu0 %vm129_vm0, %v82_v4  ;;  %1560 = vmatmul.mubr.msk.bf16.vlgmr.msra.gmra.mrb[0].mxu1 %vm129_vm0, %v82_v4  ;;  %v1814_v18 = vld [vmem:[#allocation7 + $0x64] ss:$16 sps:$4 sm:$0xff]   ;;  %v1809_v19 = vld [vmem:[#allocation7 + $0x48] ss:$16 sps:$4 sm:$0xff]   ;;  %v1817_v20 = vld [vmem:[#allocation7 + $0x6c] ss:$16 sps:$4 sm:$0xff]  }
  0x51   :  { %1014 = vmatpush1.bf16.msra.mxu0 %v1794_v7  ;;  %1096 = vmatpush1.bf16.msra.mxu1 %v1797_v9  ;;  %v1812_v21 = vld [vmem:[#allocation7 + $0x60] ss:$16 sps:$4 sm:$0xff]   ;;  %v1820_v22 = vld [vmem:[#allocation7 + $0x84] ss:$16 sps:$4 sm:$0xff]   ;;  %v1815_v23 = vld [vmem:[#allocation7 + $0x68] ss:$16 sps:$4 sm:$0xff]   ;;  %v89_v9 = vlaneseq }
  0x52   :  { %1015 = vmatprep.subr.bf16.mxu0 %v1802_v11  ;;  %1097 = vmatprep.subr.bf16.mxu1 %v1805_v13  ;;  %v1823_v24 = vld [vmem:[#allocation7 + $0x8c] ss:$16 sps:$4 sm:$0xff]   ;;  %v1818_v25 = vld [vmem:[#allocation7 + $0x80] ss:$16 sps:$4 sm:$0xff]   ;;  %v1826_v26 = vld [vmem:[#allocation7 + $0xa4] ss:$16 sps:$4 sm:$0xff]  }
  0x53   :  { %v1821_v27 = vld [vmem:[#allocation7 + $0x88] ss:$16 sps:$4 sm:$0xff]   ;;  %v1829_v28 = vld [vmem:[#allocation7 + $0xac] ss:$16 sps:$4 sm:$0xff]   ;;  %v1824_v29 = vld [vmem:[#allocation7 + $0xa0] ss:$16 sps:$4 sm:$0xff]  }
  0x54   :  { %v1832_v30 = vld [vmem:[#allocation7 + $0xc4] ss:$16 sps:$4 sm:$0xff]   ;;  %v1827_v31 = vld [vmem:[#allocation7 + $0xa8] ss:$16 sps:$4 sm:$0xff]   ;;  %v1835_v32 = vld [vmem:[#allocation7 + $0xcc] ss:$16 sps:$4 sm:$0xff]  }
  0x55   :  { %1016 = vmatpush1.bf16.msra.mxu0 %v1800_v12  ;;  %1098 = vmatpush1.bf16.msra.mxu1 %v1803_v14  ;;  %v1830_v33 = vld [vmem:[#allocation7 + $0xc0] ss:$16 sps:$4 sm:$0xff]   ;;  %v1838_v34 = vld [vmem:[#allocation7 + $0xe4] ss:$16 sps:$4 sm:$0xff]   ;;  %v1833_v35 = vld [vmem:[#allocation7 + $0xc8] ss:$16 sps:$4 sm:$0xff]  }
  0x56   :  { %1017 = vmatprep.subr.bf16.mxu0 %v1808_v15  ;;  %1099 = vmatprep.subr.bf16.mxu1 %v1811_v16  ;;  %v1841_v36 = vld [vmem:[#allocation7 + $0xec] ss:$16 sps:$4 sm:$0xff]   ;;  %v1836_v37 = vld [vmem:[#allocation7 + $0xe0] ss:$16 sps:$4 sm:$0xff]   ;;  %v1844_v38 = vld [vmem:[#allocation7 + $0x104] ss:$16 sps:$4 sm:$0xff]  }
  0x57   :  { %v1839_v39 = vld [vmem:[#allocation7 + $0xe8] ss:$16 sps:$4 sm:$0xff]   ;;  %v1847_v40 = vld [vmem:[#allocation7 + $0x10c] ss:$16 sps:$4 sm:$0xff]   ;;  %v1842_v41 = vld [vmem:[#allocation7 + $0x100] ss:$16 sps:$4 sm:$0xff]  }
  0x58   :  { %v1850_v42 = vld [vmem:[#allocation7 + $0x124] ss:$16 sps:$4 sm:$0xff]   ;;  %v1845_v43 = vld [vmem:[#allocation7 + $0x108] ss:$16 sps:$4 sm:$0xff]   ;;  %v1848_v44 = vld [vmem:[#allocation7 + $0x120] ss:$16 sps:$4 sm:$0xff]  }
  0x59   :  { %1018 = vmatpush1.bf16.msra.mxu0 %v1806_v17  ;;  %1100 = vmatpush1.bf16.msra.mxu1 %v1809_v19  ;;  %v1853_v45 = vld [vmem:[#allocation7 + $0x12c] ss:$16 sps:$4 sm:$0xff]   ;;  %v1851_v46 = vld [vmem:[#allocation7 + $0x128] ss:$16 sps:$4 sm:$0xff]   ;;  %v1856_v47 = vld [vmem:[#allocation7 + $0x144] ss:$16 sps:$4 sm:$0xff]  }
  0x5a   :  { %1019 = vmatprep.subr.bf16.mxu0 %v1814_v18  ;;  %1101 = vmatprep.subr.bf16.mxu1 %v1817_v20  ;;  %v1859_v48 = vld [vmem:[#allocation7 + $0x14c] ss:$16 sps:$4 sm:$0xff]   ;;  %v1854_v49 = vld [vmem:[#allocation7 + $0x140] ss:$16 sps:$4 sm:$0xff]   ;;  %v1862_v50 = vld [vmem:[#allocation7 + $0x164] ss:$16 sps:$4 sm:$0xff]  }
  0x5b   :  { %v1857_v51 = vld [vmem:[#allocation7 + $0x148] ss:$16 sps:$4 sm:$0xff]   ;;  %v1865_v52 = vld [vmem:[#allocation7 + $0x16c] ss:$16 sps:$4 sm:$0xff]   ;;  %v1860_v53 = vld [vmem:[#allocation7 + $0x160] ss:$16 sps:$4 sm:$0xff]  }
  0x5c   :  { %v1868_v54 = vld [vmem:[#allocation7 + $0x184] ss:$16 sps:$4 sm:$0xff]   ;;  %v1863_v55 = vld [vmem:[#allocation7 + $0x168] ss:$16 sps:$4 sm:$0xff]   ;;  %v1871_v56 = vld [vmem:[#allocation7 + $0x18c] ss:$16 sps:$4 sm:$0xff]  }
  0x5d   :  { %1020 = vmatpush1.bf16.msra.mxu0 %v1812_v21  ;;  %1102 = vmatpush1.bf16.msra.mxu1 %v1815_v23  ;;  %v1866_v57 = vld [vmem:[#allocation7 + $0x180] ss:$16 sps:$4 sm:$0xff]   ;;  %v1874_v58 = vld [vmem:[#allocation7 + $0x1a4] ss:$16 sps:$4 sm:$0xff]   ;;  %v1869_v59 = vld [vmem:[#allocation7 + $0x188] ss:$16 sps:$4 sm:$0xff]  }
  0x5e   :  { %1021 = vmatprep.subr.bf16.mxu0 %v1820_v22  ;;  %1103 = vmatprep.subr.bf16.mxu1 %v1823_v24  ;;  %v1877_v60 = vld [vmem:[#allocation7 + $0x1ac] ss:$16 sps:$4 sm:$0xff]   ;;  %v1872_v61 = vld [vmem:[#allocation7 + $0x1a0] ss:$16 sps:$4 sm:$0xff]   ;;  %v1875_v62 = vld [vmem:[#allocation7 + $0x1a8] ss:$16 sps:$4 sm:$0xff]  }
  0x5f   :  { %v1880_v63 = vld [vmem:[#allocation7 + $0x1c4] ss:$16 sps:$4 sm:$0xff]   ;;  %v1883_v0 = vld [vmem:[#allocation7 + $0x1cc] ss:$16 sps:$4 sm:$0xff]   ;;  %v1878_v1 = vld [vmem:[#allocation7 + $0x1c0] ss:$16 sps:$4 sm:$0xff]  }
  0x60   :  { %v1881_v2 = vld [vmem:[#allocation7 + $0x1c8] ss:$16 sps:$4 sm:$0xff]   ;;  %v1886_v3 = vld [vmem:[#allocation7 + $0x1e4] ss:$16 sps:$4 sm:$0xff]   ;;  %v1889_v4 = vld [vmem:[#allocation7 + $0x1ec] ss:$16 sps:$4 sm:$0xff]  }
  0x61   :  { %1022 = vmatpush1.bf16.msra.mxu0 %v1818_v25  ;;  %1104 = vmatpush1.bf16.msra.mxu1 %v1821_v27  ;;  %v1884_v5 = vld [vmem:[#allocation7 + $0x1e0] ss:$16 sps:$4 sm:$0xff]   ;;  %v1887_v6 = vld [vmem:[#allocation7 + $0x1e8] ss:$16 sps:$4 sm:$0xff]   ;;  %v1892_v7 = vld [vmem:[#allocation7 + $0x204] ss:$16 sps:$4 sm:$0xff]  }
  0x62   :  { %1023 = vmatprep.subr.bf16.mxu0 %v1826_v26  ;;  %1105 = vmatprep.subr.bf16.mxu1 %v1829_v28  ;;  %v1895_v8 = vld [vmem:[#allocation7 + $0x20c] ss:$16 sps:$4 sm:$0xff]   ;;  %v2244_v10 = vshrl.u32 %v89_v9, 7  ;;  %v2250_v12 = vld [vmem:[%s2298_s2] sm:$0xf] }
  0x63   :  { %v1952_v9 = vld [vmem:[#allocation7 + $0x344] ss:$16 sps:$4 sm:$0xff]  }
  0x64   :  { %v91_v11 = vsub.s32 0, %v2244_v10  ;;  %v95_v13 = vsub.s32 1, %v2244_v10  ;;  %v103_v14 = vsub.s32 3, %v2244_v10 }
  0x65   :  { %1024 = vmatpush1.bf16.msra.mxu0 %v1824_v29  ;;  %1106 = vmatpush1.bf16.msra.mxu1 %v1827_v31 }
  0x66   :  { %1025 = vmatprep.subr.bf16.mxu0 %v1832_v30  ;;  %1107 = vmatprep.subr.bf16.mxu1 %v1835_v32  ;;  %v92_v15 = vrot.slane %v2250_v12, %v91_v11  ;;  %v96_v16 = vrot.slane %v2250_v12, %v95_v13  ;;  %v104_v18 = vrot.slane %v2250_v12, %v103_v14  ;;  %v1890_v32 = vld [vmem:[#allocation7 + $0x200] ss:$16 sps:$4 sm:$0xff]  }
  0x69   :  { %1026 = vmatpush1.bf16.msra.mxu0 %v1830_v33  ;;  %1108 = vmatpush1.bf16.msra.mxu1 %v1833_v35  ;;  %v1893_v33 = vld [vmem:[#allocation7 + $0x208] ss:$16 sps:$4 sm:$0xff]  }
  0x6a   :  { %1027 = vmatprep.subr.bf16.mxu0 %v1838_v34  ;;  %1109 = vmatprep.subr.bf16.mxu1 %v1841_v36  ;;  %v1898_v36 = vld [vmem:[#allocation7 + $0x224] ss:$16 sps:$4 sm:$0xff]  }
  0x6d   :  { %1028 = vmatpush1.bf16.msra.mxu0 %v1836_v37  ;;  %1110 = vmatpush1.bf16.msra.mxu1 %v1839_v39  ;;  %v1901_v37 = vld [vmem:[#allocation7 + $0x22c] ss:$16 sps:$4 sm:$0xff]   ;;  %v1896_v39 = vld [vmem:[#allocation7 + $0x220] ss:$16 sps:$4 sm:$0xff]  }
  0x6e   :  { %1029 = vmatprep.subr.bf16.mxu0 %v1844_v38  ;;  %1111 = vmatprep.subr.bf16.mxu1 %v1847_v40  ;;  %v1899_v40 = vld [vmem:[#allocation7 + $0x228] ss:$16 sps:$4 sm:$0xff]  }
  0x71   :  { %1030 = vmatpush1.bf16.msra.mxu0 %v1842_v41  ;;  %1112 = vmatpush1.bf16.msra.mxu1 %v1845_v43  ;;  %v1904_v41 = vld [vmem:[#allocation7 + $0x244] ss:$16 sps:$4 sm:$0xff]   ;;  %v1902_v43 = vld [vmem:[#allocation7 + $0x240] ss:$16 sps:$4 sm:$0xff]  }
  0x72   :  { %1031 = vmatprep.subr.bf16.mxu0 %v1850_v42  ;;  %1113 = vmatprep.subr.bf16.mxu1 %v1853_v45  ;;  %v1907_v42 = vld [vmem:[#allocation7 + $0x24c] ss:$16 sps:$4 sm:$0xff]   ;;  %v1910_v45 = vld [vmem:[#allocation7 + $0x264] ss:$16 sps:$4 sm:$0xff]  }
  0x75   :  { %1032 = vmatpush1.bf16.msra.mxu0 %v1848_v44  ;;  %1114 = vmatpush1.bf16.msra.mxu1 %v1851_v46  ;;  %v1905_v44 = vld [vmem:[#allocation7 + $0x248] ss:$16 sps:$4 sm:$0xff]   ;;  %v1913_v46 = vld [vmem:[#allocation7 + $0x26c] ss:$16 sps:$4 sm:$0xff]  }
  0x76   :  { %1033 = vmatprep.subr.bf16.mxu0 %v1856_v47  ;;  %1115 = vmatprep.subr.bf16.mxu1 %v1859_v48  ;;  %v1908_v47 = vld [vmem:[#allocation7 + $0x260] ss:$16 sps:$4 sm:$0xff]   ;;  %v1911_v48 = vld [vmem:[#allocation7 + $0x268] ss:$16 sps:$4 sm:$0xff]  }
  0x79   :  { %1034 = vmatpush1.bf16.msra.mxu0 %v1854_v49  ;;  %1116 = vmatpush1.bf16.msra.mxu1 %v1857_v51  ;;  %v1916_v49 = vld [vmem:[#allocation7 + $0x284] ss:$16 sps:$4 sm:$0xff]   ;;  %v1914_v51 = vld [vmem:[#allocation7 + $0x280] ss:$16 sps:$4 sm:$0xff]  }
  0x7a   :  { %1035 = vmatprep.subr.bf16.mxu0 %v1862_v50  ;;  %1117 = vmatprep.subr.bf16.mxu1 %v1865_v52  ;;  %v1919_v50 = vld [vmem:[#allocation7 + $0x28c] ss:$16 sps:$4 sm:$0xff]   ;;  %v1917_v52 = vld [vmem:[#allocation7 + $0x288] ss:$16 sps:$4 sm:$0xff]  }
  0x7d   :  { %1036 = vmatpush1.bf16.msra.mxu0 %v1860_v53  ;;  %1118 = vmatpush1.bf16.msra.mxu1 %v1863_v55  ;;  %v1922_v53 = vld [vmem:[#allocation7 + $0x2a4] ss:$16 sps:$4 sm:$0xff]   ;;  %v1920_v55 = vld [vmem:[#allocation7 + $0x2a0] ss:$16 sps:$4 sm:$0xff]  }
  0x7e   :  { %1037 = vmatprep.subr.bf16.mxu0 %v1868_v54  ;;  %1119 = vmatprep.subr.bf16.mxu1 %v1871_v56  ;;  %v1925_v54 = vld [vmem:[#allocation7 + $0x2ac] ss:$16 sps:$4 sm:$0xff]   ;;  %v1923_v56 = vld [vmem:[#allocation7 + $0x2a8] ss:$16 sps:$4 sm:$0xff]  }
  0x81   :  { %1038 = vmatpush1.bf16.msra.mxu0 %v1866_v57  ;;  %1120 = vmatpush1.bf16.msra.mxu1 %v1869_v59  ;;  %v1928_v57 = vld [vmem:[#allocation7 + $0x2c4] ss:$16 sps:$4 sm:$0xff]   ;;  %v1926_v59 = vld [vmem:[#allocation7 + $0x2c0] ss:$16 sps:$4 sm:$0xff]  }
  0x82   :  { %1039 = vmatprep.subr.bf16.mxu0 %v1874_v58  ;;  %1121 = vmatprep.subr.bf16.mxu1 %v1877_v60  ;;  %v1931_v58 = vld [vmem:[#allocation7 + $0x2cc] ss:$16 sps:$4 sm:$0xff]   ;;  %v1929_v60 = vld [vmem:[#allocation7 + $0x2c8] ss:$16 sps:$4 sm:$0xff]  }
  0x85   :  { %1040 = vmatpush1.bf16.msra.mxu0 %v1872_v61  ;;  %1122 = vmatpush1.bf16.msra.mxu1 %v1875_v62  ;;  %v1934_v61 = vld [vmem:[#allocation7 + $0x2e4] ss:$16 sps:$4 sm:$0xff]   ;;  %v1937_v62 = vld [vmem:[#allocation7 + $0x2ec] ss:$16 sps:$4 sm:$0xff]  }
  0x86   :  { %1041 = vmatprep.subr.bf16.mxu0 %v1880_v63  ;;  %1123 = vmatprep.subr.bf16.mxu1 %v1883_v0  ;;  %v1932_v63 = vld [vmem:[#allocation7 + $0x2e0] ss:$16 sps:$4 sm:$0xff]   ;;  %v1935_v0 = vld [vmem:[#allocation7 + $0x2e8] ss:$16 sps:$4 sm:$0xff]  }
  0x89   :  { %1042 = vmatpush1.bf16.msra.mxu0 %v1878_v1  ;;  %1124 = vmatpush1.bf16.msra.mxu1 %v1881_v2  ;;  %v1940_v1 = vld [vmem:[#allocation7 + $0x304] ss:$16 sps:$4 sm:$0xff]   ;;  %v1943_v2 = vld [vmem:[#allocation7 + $0x30c] ss:$16 sps:$4 sm:$0xff]  }
  0x8a   :  { %1043 = vmatprep.subr.bf16.mxu0 %v1886_v3  ;;  %1125 = vmatprep.subr.bf16.mxu1 %v1889_v4  ;;  %v1938_v3 = vld [vmem:[#allocation7 + $0x300] ss:$16 sps:$4 sm:$0xff]   ;;  %v1941_v4 = vld [vmem:[#allocation7 + $0x308] ss:$16 sps:$4 sm:$0xff]  }
  0x8d   :  { %1044 = vmatpush1.bf16.msra.mxu0 %v1884_v5  ;;  %1126 = vmatpush1.bf16.msra.mxu1 %v1887_v6  ;;  %v1946_v5 = vld [vmem:[#allocation7 + $0x324] ss:$16 sps:$4 sm:$0xff]   ;;  %v1949_v6 = vld [vmem:[#allocation7 + $0x32c] ss:$16 sps:$4 sm:$0xff]  }
  0x8e   :  { %1054 = vmatprep.subr.bf16.mxu0 %v1892_v7  ;;  %1136 = vmatprep.subr.bf16.mxu1 %v1895_v8  ;;  %v1944_v7 = vld [vmem:[#allocation7 + $0x320] ss:$16 sps:$4 sm:$0xff]   ;;  %v1947_v8 = vld [vmem:[#allocation7 + $0x328] ss:$16 sps:$4 sm:$0xff]  }
 0x123   :  { %v167_v17 = vpop.f32.mrb[0].mxu0  ;;  %v2263_v23 = vpop.f32.mrb[0].mxu1 }
 0x124   :  { %v168_v19 = vadd.f32 %v167_v17, %v92_v15  ;;  %v169_v20 = vpop.f32.mrb[1].mxu0  ;;  %v210_v26 = vpop.f32.mrb[1].mxu1  ;;  %v1955_v15 = vld [vmem:[#allocation7 + $0x34c] ss:$16 sps:$4 sm:$0xff]   ;;  %v1953_v17 = vld [vmem:[#allocation7 + $0x348] ss:$16 sps:$4 sm:$0xff]  }
 0x125   :  { %v170_v21 = vadd.f32 %v169_v20, %v96_v16  ;;  %v171_v22 = vpop.f32.mrb[2].mxu0  ;;  %v211_v28 = vadd.f32 %v210_v26, %v104_v18  ;;  %v212_v29 = vpop.f32.mrb[2].mxu1  ;;  %v1950_v16 = vld [vmem:[#allocation7 + $0x340] ss:$16 sps:$4 sm:$0xff]   ;;  %v1958_v18 = vld [vmem:[#allocation7 + $0x364] ss:$16 sps:$4 sm:$0xff]  }
 0x126   :  { %v215_v24 = vmax.f32 %v168_v19, 0.0  ;;  %v172_v25 = vpop.f32.mrb[3].mxu0  ;;  %v213_v30 = vpop.f32.mrb[3].mxu1  ;;  %v1961_v19 = vld [vmem:[#allocation7 + $0x36c] ss:$16 sps:$4 sm:$0xff]  }
 0x127   :  { %v216_v27 = vmax.f32 %v170_v21, 0.0  ;;  %v218_v34 = vmax.f32 %v211_v28, 0.0  ;;  %v1956_v20 = vld [vmem:[#allocation7 + $0x360] ss:$16 sps:$4 sm:$0xff]   ;;  %v1959_v21 = vld [vmem:[#allocation7 + $0x368] ss:$16 sps:$4 sm:$0xff]  }
 0x128   :  { %v219_v35 = vpack.c.bf16 %v215_v24, %v215_v24  ;;  %v1964_v22 = vld [vmem:[#allocation7 + $0x384] ss:$16 sps:$4 sm:$0xff]   ;;  %v1967_v24 = vld [vmem:[#allocation7 + $0x38c] ss:$16 sps:$4 sm:$0xff]   ;;  %v1962_v25 = vld [vmem:[#allocation7 + $0x380] ss:$16 sps:$4 sm:$0xff]  }
 0x129   :  { %v220_v31 = vpack.c.bf16 %v216_v27, %v216_v27  ;;  %v222_v38 = vpack.c.bf16 %v218_v34, %v218_v34  ;;  %v1965_v26 = vld [vmem:[#allocation7 + $0x388] ss:$16 sps:$4 sm:$0xff]   ;;  %v99_v27 = vsub.s32 2, %v2244_v10  ;;  %v1970_v28 = vld [vmem:[#allocation7 + $0x3a4] ss:$16 sps:$4 sm:$0xff]  }
 0x12a   :  { %v1973_v29 = vld [vmem:[#allocation7 + $0x3ac] ss:$16 sps:$4 sm:$0xff]   ;;  %v1968_v30 = vld [vmem:[#allocation7 + $0x3a0] ss:$16 sps:$4 sm:$0xff]  }
 0x12b   :  { %1045 = vmatprep.mubr.bf16.mxu0 %v220_v31  ;;  %1127 = vmatprep.mubr.bf16.mxu1 %v220_v31  ;;  %v1971_v31 = vld [vmem:[#allocation7 + $0x3a8] ss:$16 sps:$4 sm:$0xff]   ;;  %v1979_v34 = vld [vmem:[#allocation7 + $0x3cc] ss:$16 sps:$4 sm:$0xff]  }
 0x12c   :  { %1046 = vmatmul.mubr.bf16.vlgmr.msra.gmra.mrb[4].mxu0 %v219_v35  ;;  %1128 = vmatmul.mubr.bf16.vlgmr.msra.gmra.mrb[4].mxu1 %v219_v35  ;;  %v1974_v35 = vld [vmem:[#allocation7 + $0x3c0] ss:$16 sps:$4 sm:$0xff]  }
 0x12d   :  { %1055 = vmatpush1.bf16.msra.mxu0 %v1890_v32  ;;  %1137 = vmatpush1.bf16.msra.mxu1 %v1893_v33  ;;  %v100_v32 = vrot.slane %v2250_v12, %v99_v27  ;;  %v1976_v33 = vld [vmem:[#allocation7 + $0x3c4] ss:$16 sps:$4 sm:$0xff]  }
 0x12e   :  { %1056 = vmatprep.subr.bf16.mxu0 %v1898_v36  ;;  %1138 = vmatprep.subr.bf16.mxu1 %v1901_v37  ;;  %v1977_v36 = vld [vmem:[#allocation7 + $0x3c8] ss:$16 sps:$4 sm:$0xff]   ;;  %v1986_v12 = vld [vmem:[#allocation8 + $0x40] sm:$0xff]  }
 0x12f   :  { %1086 = vmatprep.mubr.bf16.mxu0 %v222_v38  ;;  %1168 = vmatprep.mubr.bf16.mxu1 %v222_v38  ;;  %v209_v37 = vadd.f32 %v2263_v23, %v100_v32  ;;  %v1982_v38 = vld [vmem:[#allocation7 + $0x3e4] ss:$16 sps:$4 sm:$0xff]   ;;  %v1990_v23 = vld [vmem:[#allocation8 + $0x48] sm:$0xff]  }
 0x131   :  { %1057 = vmatpush1.bf16.msra.mxu0 %v1896_v39  ;;  %1139 = vmatpush1.bf16.msra.mxu1 %v1899_v40  ;;  %v1985_v39 = vld [vmem:[#allocation7 + $0x3ec] ss:$16 sps:$4 sm:$0xff]   ;;  %v1980_v40 = vld [vmem:[#allocation7 + $0x3e0] ss:$16 sps:$4 sm:$0xff]  }
 0x132   :  { %1058 = vmatprep.subr.bf16.mxu0 %v1904_v41  ;;  %1140 = vmatprep.subr.bf16.mxu1 %v1907_v42  ;;  %v1983_v41 = vld [vmem:[#allocation7 + $0x3e8] ss:$16 sps:$4 sm:$0xff]   ;;  %v217_v42 = vmax.f32 %v209_v37, 0.0 }
 0x135   :  { %1059 = vmatpush1.bf16.msra.mxu0 %v1902_v43  ;;  %1141 = vmatpush1.bf16.msra.mxu1 %v1905_v44  ;;  %v1987_v43 = vld [vmem:[#allocation8 + $0xc0] sm:$0xff]  }
 0x136   :  { %1060 = vmatprep.subr.bf16.mxu0 %v1910_v45  ;;  %1142 = vmatprep.subr.bf16.mxu1 %v1913_v46  ;;  %v1988_v44 = vld [vmem:[#allocation8] sm:$0xff]   ;;  %v221_v46 = vpack.c.bf16 %v217_v42, %v217_v42 }
 0x137   :  { %v1989_v45 = vld [vmem:[#allocation8 + $0x80] sm:$0xff]  }
 0x139   :  { %1061 = vmatpush1.bf16.msra.mxu0 %v1908_v47  ;;  %1143 = vmatpush1.bf16.msra.mxu1 %v1911_v48  ;;  %v1991_v47 = vld [vmem:[#allocation8 + $0xc8] sm:$0xff]  }
 0x13a   :  { %1062 = vmatprep.subr.bf16.mxu0 %v1916_v49  ;;  %1144 = vmatprep.subr.bf16.mxu1 %v1919_v50  ;;  %v1992_v48 = vld [vmem:[#allocation8 + $0x8] sm:$0xff]   ;;  %v1994_v50 = vld [vmem:[#allocation8 + $0x50] sm:$0xff]  }
 0x13b   :  { %v1993_v49 = vld [vmem:[#allocation8 + $0x88] sm:$0xff]  }
 0x13d   :  { %1063 = vmatpush1.bf16.msra.mxu0 %v1914_v51  ;;  %1145 = vmatpush1.bf16.msra.mxu1 %v1917_v52  ;;  %v1995_v51 = vld [vmem:[#allocation8 + $0xd0] sm:$0xff]  }
 0x13e   :  { %1064 = vmatprep.subr.bf16.mxu0 %v1922_v53  ;;  %1146 = vmatprep.subr.bf16.mxu1 %v1925_v54  ;;  %v1996_v52 = vld [vmem:[#allocation8 + $0x10] sm:$0xff]   ;;  %v1998_v54 = vld [vmem:[#allocation8 + $0x58] sm:$0xff]  }
 0x13f   :  { %v1997_v53 = vld [vmem:[#allocation8 + $0x90] sm:$0xff]  }
 0x141   :  { %1065 = vmatpush1.bf16.msra.mxu0 %v1920_v55  ;;  %1147 = vmatpush1.bf16.msra.mxu1 %v1923_v56  ;;  %v1999_v55 = vld [vmem:[#allocation8 + $0xd8] sm:$0xff]  }
 0x142   :  { %1066 = vmatprep.subr.bf16.mxu0 %v1928_v57  ;;  %1148 = vmatprep.subr.bf16.mxu1 %v1931_v58  ;;  %v2000_v56 = vld [vmem:[#allocation8 + $0x18] sm:$0xff]   ;;  %v2002_v58 = vld [vmem:[#allocation8 + $0x60] sm:$0xff]  }
 0x143   :  { %v2001_v57 = vld [vmem:[#allocation8 + $0x98] sm:$0xff]  }
 0x145   :  { %1067 = vmatpush1.bf16.msra.mxu0 %v1926_v59  ;;  %1149 = vmatpush1.bf16.msra.mxu1 %v1929_v60  ;;  %v2003_v59 = vld [vmem:[#allocation8 + $0xe0] sm:$0xff]  }
 0x146   :  { %1068 = vmatprep.subr.bf16.mxu0 %v1934_v61  ;;  %1150 = vmatprep.subr.bf16.mxu1 %v1937_v62  ;;  %v2004_v60 = vld [vmem:[#allocation8 + $0x20] sm:$0xff]   ;;  %v2006_v62 = vld [vmem:[#allocation8 + $0x68] sm:$0xff]  }
 0x147   :  { %v2005_v61 = vld [vmem:[#allocation8 + $0xa0] sm:$0xff]  }
 0x149   :  { %1069 = vmatpush1.bf16.msra.mxu0 %v1932_v63  ;;  %1151 = vmatpush1.bf16.msra.mxu1 %v1935_v0  ;;  %v2007_v63 = vld [vmem:[#allocation8 + $0xe8] sm:$0xff]  }
 0x14a   :  { %1070 = vmatprep.subr.bf16.mxu0 %v1940_v1  ;;  %1152 = vmatprep.subr.bf16.mxu1 %v1943_v2  ;;  %v2008_v0 = vld [vmem:[#allocation8 + $0x28] sm:$0xff]   ;;  %v2010_v2 = vld [vmem:[#allocation8 + $0x70] sm:$0xff]  }
 0x14b   :  { %v2009_v1 = vld [vmem:[#allocation8 + $0xa8] sm:$0xff]  }
 0x14d   :  { %1071 = vmatpush1.bf16.msra.mxu0 %v1938_v3  ;;  %1153 = vmatpush1.bf16.msra.mxu1 %v1941_v4  ;;  %v2011_v3 = vld [vmem:[#allocation8 + $0xf0] sm:$0xff]  }
 0x14e   :  { %1072 = vmatprep.subr.bf16.mxu0 %v1946_v5  ;;  %1154 = vmatprep.subr.bf16.mxu1 %v1949_v6  ;;  %v2012_v4 = vld [vmem:[#allocation8 + $0x30] sm:$0xff]   ;;  %v2014_v6 = vld [vmem:[#allocation8 + $0x78] sm:$0xff]  }
 0x14f   :  { %v2013_v5 = vld [vmem:[#allocation8 + $0xb0] sm:$0xff]  }
 0x151   :  { %1073 = vmatpush1.bf16.msra.mxu0 %v1944_v7  ;;  %1155 = vmatpush1.bf16.msra.mxu1 %v1947_v8  ;;  %v2015_v7 = vld [vmem:[#allocation8 + $0xf8] sm:$0xff]  }
 0x152   :  { %1074 = vmatprep.subr.bf16.mxu0 %v1952_v9  ;;  %1156 = vmatprep.subr.bf16.mxu1 %v1955_v15  ;;  %v2016_v8 = vld [vmem:[#allocation8 + $0x38] sm:$0xff]  }
 0x153   :  { %v2017_v9 = vld [vmem:[#allocation8 + $0xb8] sm:$0xff]  }
 0x154   :  { %v351_v15 = vld [vmem:[%s2300_s4] sm:$0xf] }
 0x155   :  { %1075 = vmatpush1.bf16.msra.mxu0 %v1950_v16  ;;  %1157 = vmatpush1.bf16.msra.mxu1 %v1953_v17  ;;  %v356_v16 = vrot.slane %v351_v15, %v91_v11  ;;  %v364_v17 = vrot.slane %v351_v15, %v99_v27 }
 0x156   :  { %1076 = vmatprep.subr.bf16.mxu0 %v1958_v18  ;;  %1158 = vmatprep.subr.bf16.mxu1 %v1961_v19  ;;  %v360_v18 = vrot.slane %v351_v15, %v95_v13  ;;  %v368_v19 = vrot.slane %v351_v15, %v103_v14 }
 0x159   :  { %1077 = vmatpush1.bf16.msra.mxu0 %v1956_v20  ;;  %1159 = vmatpush1.bf16.msra.mxu1 %v1959_v21 }
 0x15a   :  { %1078 = vmatprep.subr.bf16.mxu0 %v1964_v22  ;;  %1160 = vmatprep.subr.bf16.mxu1 %v1967_v24 }
 0x15d   :  { %1079 = vmatpush1.bf16.msra.mxu0 %v1962_v25  ;;  %1161 = vmatpush1.bf16.msra.mxu1 %v1965_v26 }
 0x15e   :  { %1080 = vmatprep.subr.bf16.mxu0 %v1970_v28  ;;  %1162 = vmatprep.subr.bf16.mxu1 %v1973_v29 }
 0x161   :  { %1081 = vmatpush1.bf16.msra.mxu0 %v1968_v30  ;;  %1163 = vmatpush1.bf16.msra.mxu1 %v1971_v31 }
 0x162   :  { %1082 = vmatprep.subr.bf16.mxu0 %v1976_v33  ;;  %1164 = vmatprep.subr.bf16.mxu1 %v1979_v34 }
 0x165   :  { %1083 = vmatpush1.bf16.msra.mxu0 %v1974_v35  ;;  %1165 = vmatpush1.bf16.msra.mxu1 %v1977_v36 }
 0x166   :  { %1084 = vmatprep.subr.bf16.mxu0 %v1982_v38  ;;  %1166 = vmatprep.subr.bf16.mxu1 %v1985_v39  ;;  %v1689_v39 = vld [vmem:[%s2302_s6] ss:$0 sm:$0xff]  ;;  %s2149_s6 = smov [#allocation10]  }
 0x167   :  { %s1544_s29 = sshll.u32 %s2149_s6, 4  ;;  %s1545_s29 = int_to_ptr.vmem [resolvable:$true] %s1544_s29 }
 0x168   :  { %s2110_s30 = scalar_lea.vmem %s1545_s29, 128  ;;  %p2115_p5 = scmp.lt.s32.totalorder %s1545_s29, %s1545_s29 }
 0x169   :  { %1085 = vmatpush1.bf16.msra.mxu0 %v1980_v40  ;;  %1167 = vmatpush1.bf16.msra.mxu1 %v1983_v41  ;;  %p2111_p4 = scmp.ne.s32.totalorder %s1545_s29, %s2110_s30  ;;  %p2116_p6 = scmp.lt.s32.totalorder %s2110_s30, %s2110_s30 }
 0x16a   :  { %1722 = vmatprep.subr.bf16.mxu0 %v1986_v12  ;;  %1744 = vmatprep.subr.bf16.mxu1 %v1987_v43 }
 0x16b   :  { %p2117_p7 = por %p2116_p6, %p2115_p5 }
 0x16c   :  { %1087 = vmatmul.mubr.bf16.vlgmr.msra.gmra.mrb[4].mxu0 %v221_v46  ;;  %1169 = vmatmul.mubr.bf16.vlgmr.msra.gmra.mrb[4].mxu1 %v221_v46 }
 0x16d   :  { %1723 = vmatpush3.bf16.msra.mxu0 %v1988_v44  ;;  %1745 = vmatpush3.bf16.msra.mxu1 %v1989_v45  ;;  %p2118_p8 = pnand %p2117_p7, %p2111_p4 }
 0x16e   :  { %1724 = vmatprep.subr.bf16.mxu0 %v1990_v23  ;;  %1746 = vmatprep.subr.bf16.mxu1 %v1991_v47 }
 0x171   :  { %1725 = vmatpush3.bf16.msra.mxu0 %v1992_v48  ;;  %1747 = vmatpush3.bf16.msra.mxu1 %v1993_v49 }
 0x172   :  { %1726 = vmatprep.subr.bf16.mxu0 %v1994_v50  ;;  %1748 = vmatprep.subr.bf16.mxu1 %v1995_v51 }
 0x175   :  { %1727 = vmatpush3.bf16.msra.mxu0 %v1996_v52  ;;  %1749 = vmatpush3.bf16.msra.mxu1 %v1997_v53 }
 0x176   :  { %1728 = vmatprep.subr.bf16.mxu0 %v1998_v54  ;;  %1750 = vmatprep.subr.bf16.mxu1 %v1999_v55 }
 0x179   :  { %1729 = vmatpush3.bf16.msra.mxu0 %v2000_v56  ;;  %1751 = vmatpush3.bf16.msra.mxu1 %v2001_v57 }
 0x17a   :  { %1730 = vmatprep.subr.bf16.mxu0 %v2002_v58  ;;  %1752 = vmatprep.subr.bf16.mxu1 %v2003_v59 }
 0x17d   :  { %1731 = vmatpush3.bf16.msra.mxu0 %v2004_v60  ;;  %1753 = vmatpush3.bf16.msra.mxu1 %v2005_v61 }
 0x17e   :  { %1732 = vmatprep.subr.bf16.mxu0 %v2006_v62  ;;  %1754 = vmatprep.subr.bf16.mxu1 %v2007_v63 }
 0x181   :  { %1733 = vmatpush3.bf16.msra.mxu0 %v2008_v0  ;;  %1755 = vmatpush3.bf16.msra.mxu1 %v2009_v1 }
 0x182   :  { %1734 = vmatprep.subr.bf16.mxu0 %v2010_v2  ;;  %1756 = vmatprep.subr.bf16.mxu1 %v2011_v3 }
 0x185   :  { %1735 = vmatpush3.bf16.msra.mxu0 %v2012_v4  ;;  %1757 = vmatpush3.bf16.msra.mxu1 %v2013_v5 }
 0x186   :  { %1736 = vmatprep.subr.bf16.mxu0 %v2014_v6  ;;  %1758 = vmatprep.subr.bf16.mxu1 %v2015_v7 }
 0x189   :  { %1737 = vmatpush3.bf16.msra.mxu0 %v2016_v8  ;;  %1759 = vmatpush3.bf16.msra.mxu1 %v2017_v9 }
 0x23f   :  { %v1088_v20 = vpop.f32.mrb[4].mxu0  ;;  %v1170_v21 = vpop.f32.mrb[4].mxu1 }
 0x240   :  { %v1766_v22 = vadd.f32 %v1088_v20, %v356_v16  ;;  %v1768_v24 = vadd.f32 %v1170_v21, %v364_v17  ;;  %v1090_v25 = vpop.f32.mrb[5].mxu0  ;;  %v1172_v26 = vpop.f32.mrb[5].mxu1 }
 0x241   :  { %v1767_v28 = vadd.f32 %v1090_v25, %v360_v18  ;;  %v1769_v29 = vadd.f32 %v1172_v26, %v368_v19  ;;  %v1092_v30 = vpop.f32.mrb[6].mxu0  ;;  %v1174_v31 = vpop.f32.mrb[6].mxu1 }
 0x242   :  { %v1177_v11 = vmax.f32 %v1766_v22, 0.0  ;;  %v1179_v32 = vmax.f32 %v1768_v24, 0.0  ;;  %v1093_v33 = vpop.f32.mrb[7].mxu0  ;;  %v1175_v27 = vpop.f32.mrb[7].mxu1 }
 0x243   :  { %v1178_v34 = vmax.f32 %v1767_v28, 0.0  ;;  %v1180_v35 = vmax.f32 %v1769_v29, 0.0 }
 0x244   :  { %v1181_v10 = vpack.c.bf16 %v1177_v11, %v1177_v11  ;;  %v1183_v14 = vpack.c.bf16 %v1179_v32, %v1179_v32 }
 0x245   :  { %v1182_v13 = vpack.c.bf16 %v1178_v34, %v1178_v34  ;;  %v1184_v36 = vpack.c.bf16 %v1180_v35, %v1180_v35 }
 0x247   :  { %1480 = vmatprep.mubr.bf16.mxu0 %v1182_v13  ;;  %1520 = vmatprep.mubr.bf16.mxu1 %v1184_v36 }
 0x248   :  { %1481 = vmatmul.mubr.bf16.vlgmr.msra.gmra.mrb[8].mxu0 %v1181_v10  ;;  %1521 = vmatmul.mubr.bf16.vlgmr.msra.gmra.mrb[8].mxu1 %v1183_v14 }
 0x31b   :  { %v1738_v37 = vpop.f32.mrb[8].mxu0  ;;  %v1760_v38 = vpop.f32.mrb[8].mxu1 }
 0x31c   :  { %v1739_v40 = vpop.f32.mrb[9].mxu0  ;;  %v1761_v41 = vpop.f32.mrb[9].mxu1 }
 0x31d   :  { %v1740_v42 = vadd.f32 %v1739_v40, %v1738_v37  ;;  %v1762_v12 = vadd.f32 %v1761_v41, %v1760_v38  ;;  %v1741_v43 = vpop.f32.mrb[10].mxu0  ;;  %v1763_v44 = vpop.f32.mrb[10].mxu1 }
 0x31e   :  { %v1742_v45 = vpop.f32.mrb[11].mxu0  ;;  %v1764_v46 = vpop.f32.mrb[11].mxu1 }
 0x31f   :  { %v1483_v23 = vadd.f32 %v1740_v42, %v1689_v39 }
 0x321   :  { %v1523_v47 = vadd.f32 %v1762_v12, %v1483_v23 }
 0x323   :  { %1528 = vmax.xlane.f32.xlu0 %v1523_v47 }
 0x3b0   :  { %v1529_v48 = vpop.xlane.xlu0 %1528 }
 0x3b1   :  { %v1530_v49 = vsub.f32 %v1523_v47, %v1529_v48 }
 0x3b3   :  { %v1531_v50 = vmul.f32 1.442695, %v1530_v49 }
 0x3b5   :  { %2018 = vpow2.f32 %v1531_v50 }
 0x3bf   :  { %v2019_v51 = vpop.eup %2018 }
 0x3c0   :  { %1533 = vadd.xlane.f32.xlu0 %v2019_v51 }
 0x44d   :  { %v1534_v52 = vpop.xlane.xlu0 %1533 }
 0x44e   :  { %2020 = vrcp.f32 %v1534_v52 }
 0x458   :  { %v2021_v53 = vpop.eup %2020 }
 0x459   :  { %v1536_v54 = vmul.f32 %v2021_v53, %v2019_v51 }
 0x45b   :  { %1537 = vst [vmem:[#allocation10] sm:$0xff] %v1536_v54 }
 0x45c   :  { %2121 = shalt.err (!%p2118_p8)
}
 0x45d   :  { %s2122_s10 = scalar_lea.hbm %s2303_s7, 128 }
 0x45e   :  { %p2123_p9 = scmp.ne.s32.totalorder %s2303_s7, %s2122_s10  ;;  %p2126_p10 = scmp.lt.u32.totalorder %s2122_s10, %s2303_s7 }
 0x460   :  { %p2128_p11 = pnand %p2126_p10, %p2123_p9 }
 0x462   :  { %2131 = shalt.err (!%p2128_p11)
}
 0x463   :  { %1547 = dma.vmem_to_hbm [thread:$0]  %s1545_s29, 128, %s2303_s7, [#allocation4]  }
 0x464   :  { %2138 = dma.done.wait [#allocation4], 128  }
 0x465   :  { %2139 = vsyncadd [#allocation4], 4294967168 }
 0x466   :  { %1551 = vsyncpa [#allocation3], 1 }
 0x467   :  { %1552 = vsyncpa [#allocation6], 1 }
 0x468   :  { %1553 = vsyncpa [#allocation9], 1 }
 0x469   :  { %1554 = vsyncpa [#allocation4], 1 }

// kernel: tpu_custom_call.1
= control target key start
LH: loop header
LB: loop body
LE: loop exit
PB: predicated region body
PF: predicated region fallthrough
CT: control target
= control target key end

     0   :  { %12 = vsyncpa [#allocation3], 0  ;;  %s2296_s0 = inlined_call_operand.hbm [shape: f32[8,16], index: 0, kind: input, shape index: {}]   ;;  %s2297_s1 = inlined_call_operand.hbm [shape: bf16[16,512], index: 1, kind: input, shape index: {}]   ;;  %s2298_s2 = inlined_call_operand.vmem [shape: f32[1,512], index: 2, kind: input, shape index: {}]   ;;  %s2299_s3 = inlined_call_operand.hbm [shape: bf16[512,512], index: 3, kind: input, shape index: {}]   ;;  %s2300_s4 = inlined_call_operand.vmem [shape: f32[1,512], index: 4, kind: input, shape index: {}]   ;;  %s2301_s5 = inlined_call_operand.hbm [shape: bf16[512,128], index: 5, kind: input, shape index: {}]   ;;  %s2302_s6 = inlined_call_operand.vmem [shape: f32[1,128], index: 6, kind: input, shape index: {}]   ;;  %s2303_s7 = inlined_call_operand.hbm [shape: f32[8,128], index: 7, kind: output, shape index: {}]  }
   0x1   :  { %13 = vsyncpa [#allocation6], 0 }
   0x2   :  { %14 = vsyncpa [#allocation9], 0 }
   0x3   :  { %15 = vsyncpa [#allocation4], 0  ;;  %s2140_s24 = smov [#allocation5]   ;;  %s2022_s28 = scalar_lea.hbm %s2297_s1, 512 }
   0x4   :  { %s31_s25 = sshll.u32 %s2140_s24, 4  ;;  %p2023_p0 = scmp.ne.s32.totalorder %s2297_s1, %s2022_s28  ;;  %s32_s25 = int_to_ptr.vmem [resolvable:$true] %s31_s25 }
   0x5   :  { %p2026_p1 = scmp.lt.u32.totalorder %s2022_s28, %s2297_s1 }
   0x7   :  { %p2028_p2 = pnand %p2026_p1, %p2023_p0 }
   0x9   :  { %2031 = shalt.err (!%p2028_p2)
}
   0xa   :  { %s2032_s10 = scalar_lea.vmem %s32_s25, 512  ;;  %p2037_p4 = scmp.lt.s32.totalorder %s32_s25, %s32_s25 }
   0xb   :  { %p2033_p3 = scmp.ne.s32.totalorder %s32_s25, %s2032_s10  ;;  %p2038_p5 = scmp.lt.s32.totalorder %s2032_s10, %s2032_s10 }
   0xd   :  { %p2039_p6 = por %p2038_p5, %p2037_p4 }
   0xf   :  { %p2040_p7 = pnand %p2039_p6, %p2033_p3 }
  0x11   :  { %2043 = shalt.err (!%p2040_p7)
}
  0x12   :  { %s2141_s11 = smov 256   ;;  %s2142_s12 = smov 16  }
  0x13   :  { %37 = dma.hbm_to_vmem [thread:$0]  %s2297_s1, 512, %s32_s25, [#allocation6], %s2141_s11, %s2141_s11, %s2142_s12  }
  0x14   :  { %s2143_s15 = smov [#allocation2]   ;;  %s2144_s17 = smov [#allocation7]  }
  0x15   :  { %s22_s16 = sshll.u32 %s2143_s15, 4  ;;  %s45_s18 = sshll.u32 %s2144_s17, 4  ;;  %s23_s16 = int_to_ptr.vmem [resolvable:$true] %s22_s16  ;;  %s46_s18 = int_to_ptr.vmem [resolvable:$true] %s45_s18 }
  0x16   :  { %s2044_s21 = scalar_lea.hbm %s2296_s0, 128 }
  0x17   :  { %p2045_p8 = scmp.ne.s32.totalorder %s2296_s0, %s2044_s21  ;;  %p2048_p9 = scmp.lt.u32.totalorder %s2044_s21, %s2296_s0 }
  0x19   :  { %p2050_p10 = pnand %p2048_p9, %p2045_p8 }
  0x1b   :  { %2053 = shalt.err (!%p2050_p10)
}
  0x1c   :  { %s2054_s1 = scalar_lea.vmem %s23_s16, 128  ;;  %p2059_p12 = scmp.lt.s32.totalorder %s23_s16, %s23_s16 }
  0x1d   :  { %p2055_p11 = scmp.ne.s32.totalorder %s23_s16, %s2054_s1  ;;  %p2060_p13 = scmp.lt.s32.totalorder %s2054_s1, %s2054_s1 }
  0x1f   :  { %p2061_p0 = por %p2060_p13, %p2059_p12 }
  0x21   :  { %p2062_p1 = pnand %p2061_p0, %p2055_p11 }
  0x23   :  { %2065 = shalt.err (!%p2062_p1)
}
  0x24   :  { %25 = dma.hbm_to_vmem [thread:$0]  %s2296_s0, 128, %s23_s16, [#allocation3]  }
  0x25   :  { %s2066_s30 = scalar_lea.hbm %s2299_s3, 16384 }
  0x26   :  { %p2067_p2 = scmp.ne.s32.totalorder %s2299_s3, %s2066_s30  ;;  %p2070_p3 = scmp.lt.u32.totalorder %s2066_s30, %s2299_s3 }
  0x28   :  { %p2072_p4 = pnand %p2070_p3, %p2067_p2 }
  0x2a   :  { %2075 = shalt.err (!%p2072_p4)
}
  0x2b   :  { %s2076_s14 = scalar_lea.vmem %s46_s18, 16384  ;;  %p2081_p6 = scmp.lt.s32.totalorder %s46_s18, %s46_s18 }
  0x2c   :  { %p2077_p5 = scmp.ne.s32.totalorder %s46_s18, %s2076_s14  ;;  %p2082_p7 = scmp.lt.s32.totalorder %s2076_s14, %s2076_s14 }
  0x2e   :  { %p2083_p8 = por %p2082_p7, %p2081_p6 }
  0x30   :  { %p2084_p9 = pnand %p2083_p8, %p2077_p5 }
  0x32   :  { %2087 = shalt.err (!%p2084_p9)
}
  0x33   :  { %51 = dma.hbm_to_vmem [thread:$0]  %s2299_s3, 16384, %s46_s18, [#allocation6], %s2141_s11, %s2141_s11, %s2142_s12  }
  0x34   :  { %s2145_s16 = smov [#allocation8]   ;;  %s2088_s21 = scalar_lea.hbm %s2301_s5, 4096 }
  0x35   :  { %s59_s17 = sshll.u32 %s2145_s16, 4  ;;  %p2089_p10 = scmp.ne.s32.totalorder %s2301_s5, %s2088_s21  ;;  %s60_s17 = int_to_ptr.vmem [resolvable:$true] %s59_s17 }
  0x36   :  { %p2092_p11 = scmp.lt.u32.totalorder %s2088_s21, %s2301_s5 }
  0x38   :  { %p2094_p12 = pnand %p2092_p11, %p2089_p10 }
  0x3a   :  { %2097 = shalt.err (!%p2094_p12)
}
  0x3b   :  { %s2098_s1 = scalar_lea.vmem %s60_s17, 4096  ;;  %p2103_p0 = scmp.lt.s32.totalorder %s60_s17, %s60_s17 }
  0x3c   :  { %p2099_p13 = scmp.ne.s32.totalorder %s60_s17, %s2098_s1  ;;  %p2104_p1 = scmp.lt.s32.totalorder %s2098_s1, %s2098_s1 }
  0x3e   :  { %p2105_p2 = por %p2104_p1, %p2103_p0 }
  0x40   :  { %p2106_p3 = pnand %p2105_p2, %p2099_p13 }
  0x42   :  { %2109 = shalt.err (!%p2106_p3)
}
  0x43   :  { %s2146_s3 = smov 64   ;;  %s2147_s11 = smov 4  }
  0x44   :  { %65 = dma.hbm_to_vmem [thread:$0]  %s2301_s5, 4096, %s60_s17, [#allocation9], %s2146_s3, %s2146_s3, %s2147_s11  }
  0x45   :  { %2132 = dma.done.wait [#allocation3], 128  }
  0x46   :  { %2133 = vsyncadd [#allocation3], 4294967168 }
  0x47   :  { %2134 = dma.done.wait [#allocation6], 16896  }
  0x48   :  { %2135 = vsyncadd [#allocation6], 4294950400 }
  0x49   :  { %2136 = dma.done.wait [#allocation9], 4096  }
  0x4a   :  { %2137 = vsyncadd [#allocation9], 4294963200  ;;  %v2148_v0 = vmov 0   ;;  %v1788_v1 = vld [vmem:[#allocation5 + $0x4] ss:$16 sps:$4 sm:$0xff]   ;;  %v81_v3 = vld [vmem:[#allocation2] sm:$0xff] }
  0x4b   :  { %165 = vmatprep.mubr.bf16.mxu0 %v2148_v0  ;;  %206 = vmatprep.mubr.bf16.mxu1 %v2148_v0  ;;  %v1790_v2 = vld [vmem:[#allocation5] ss:$16 sps:$4 sm:$0xff]   ;;  %v82_v4 = vpack.c.bf16 %v81_v3, %v81_v3  ;;  %v1791_v5 = vld [vmem:[#allocation5 + $0xc] ss:$16 sps:$4 sm:$0xff]   ;;  %v1793_v6 = vld [vmem:[#allocation5 + $0x8] ss:$16 sps:$4 sm:$0xff]  }
  0x4c   :  { %133 = vmatprep.subr.bf16.mxu0 %v1788_v1  ;;  %vm129_vm0 = vcmask 130048   ;;  %v1794_v7 = vld [vmem:[#allocation7] ss:$16 sps:$4 sm:$0xff]   ;;  %174 = vmatprep.subr.bf16.mxu1 %v1791_v5  ;;  %v1796_v8 = vld [vmem:[#allocation7 + $0x4] ss:$16 sps:$4 sm:$0xff]  }
  0x4d   :  { %134 = vmatpush1.bf16.msra.mxu0 %v1790_v2  ;;  %175 = vmatpush1.bf16.msra.mxu1 %v1793_v6  ;;  %v1797_v9 = vld [vmem:[#allocation7 + $0x8] ss:$16 sps:$4 sm:$0xff]   ;;  %v1799_v10 = vld [vmem:[#allocation7 + $0xc] ss:$16 sps:$4 sm:$0xff]   ;;  %v1802_v11 = vld [vmem:[#allocation7 + $0x24] ss:$16 sps:$4 sm:$0xff]  }
  0x4e   :  { %1013 = vmatprep.subr.bf16.mxu0 %v1796_v8  ;;  %1095 = vmatprep.subr.bf16.mxu1 %v1799_v10  ;;  %v1800_v12 = vld [vmem:[#allocation7 + $0x20] ss:$16 sps:$4 sm:$0xff]   ;;  %v1805_v13 = vld [vmem:[#allocation7 + $0x2c] ss:$16 sps:$4 sm:$0xff]   ;;  %v1803_v14 = vld [vmem:[#allocation7 + $0x28] ss:$16 sps:$4 sm:$0xff]  }
  0x4f   :  { %v1808_v15 = vld [vmem:[#allocation7 + $0x44] ss:$16 sps:$4 sm:$0xff]   ;;  %v1811_v16 = vld [vmem:[#allocation7 + $0x4c] ss:$16 sps:$4 sm:$0xff]   ;;  %v1806_v17 = vld [vmem:[#allocation7 + $0x40] ss:$16 sps:$4 sm:$0xff]  }
  0x50   :  { %1559 = vmatmul.mubr.msk.bf16.vlgmr.msra.gmra.mrb[0].mxu0 %vm129_vm0, %v82_v4  ;;  %1560 = vmatmul.mubr.msk.bf16.vlgmr.msra.gmra.mrb[0].mxu1 %vm129_vm0, %v82_v4  ;;  %v1814_v18 = vld [vmem:[#allocation7 + $0x64] ss:$16 sps:$4 sm:$0xff]   ;;  %v1809_v19 = vld [vmem:[#allocation7 + $0x48] ss:$16 sps:$4 sm:$0xff]   ;;  %v1817_v20 = vld [vmem:[#allocation7 + $0x6c] ss:$16 sps:$4 sm:$0xff]  }
  0x51   :  { %1014 = vmatpush1.bf16.msra.mxu0 %v1794_v7  ;;  %1096 = vmatpush1.bf16.msra.mxu1 %v1797_v9  ;;  %v1812_v21 = vld [vmem:[#allocation7 + $0x60] ss:$16 sps:$4 sm:$0xff]   ;;  %v1820_v22 = vld [vmem:[#allocation7 + $0x84] ss:$16 sps:$4 sm:$0xff]   ;;  %v1815_v23 = vld [vmem:[#allocation7 + $0x68] ss:$16 sps:$4 sm:$0xff]   ;;  %v89_v9 = vlaneseq }
  0x52   :  { %1015 = vmatprep.subr.bf16.mxu0 %v1802_v11  ;;  %1097 = vmatprep.subr.bf16.mxu1 %v1805_v13  ;;  %v1823_v24 = vld [vmem:[#allocation7 + $0x8c] ss:$16 sps:$4 sm:$0xff]   ;;  %v1818_v25 = vld [vmem:[#allocation7 + $0x80] ss:$16 sps:$4 sm:$0xff]   ;;  %v1826_v26 = vld [vmem:[#allocation7 + $0xa4] ss:$16 sps:$4 sm:$0xff]  }
  0x53   :  { %v1821_v27 = vld [vmem:[#allocation7 + $0x88] ss:$16 sps:$4 sm:$0xff]   ;;  %v1829_v28 = vld [vmem:[#allocation7 + $0xac] ss:$16 sps:$4 sm:$0xff]   ;;  %v1824_v29 = vld [vmem:[#allocation7 + $0xa0] ss:$16 sps:$4 sm:$0xff]  }
  0x54   :  { %v1832_v30 = vld [vmem:[#allocation7 + $0xc4] ss:$16 sps:$4 sm:$0xff]   ;;  %v1827_v31 = vld [vmem:[#allocation7 + $0xa8] ss:$16 sps:$4 sm:$0xff]   ;;  %v1835_v32 = vld [vmem:[#allocation7 + $0xcc] ss:$16 sps:$4 sm:$0xff]  }
  0x55   :  { %1016 = vmatpush1.bf16.msra.mxu0 %v1800_v12  ;;  %1098 = vmatpush1.bf16.msra.mxu1 %v1803_v14  ;;  %v1830_v33 = vld [vmem:[#allocation7 + $0xc0] ss:$16 sps:$4 sm:$0xff]   ;;  %v1838_v34 = vld [vmem:[#allocation7 + $0xe4] ss:$16 sps:$4 sm:$0xff]   ;;  %v1833_v35 = vld [vmem:[#allocation7 + $0xc8] ss:$16 sps:$4 sm:$0xff]  }
  0x56   :  { %1017 = vmatprep.subr.bf16.mxu0 %v1808_v15  ;;  %1099 = vmatprep.subr.bf16.mxu1 %v1811_v16  ;;  %v1841_v36 = vld [vmem:[#allocation7 + $0xec] ss:$16 sps:$4 sm:$0xff]   ;;  %v1836_v37 = vld [vmem:[#allocation7 + $0xe0] ss:$16 sps:$4 sm:$0xff]   ;;  %v1844_v38 = vld [vmem:[#allocation7 + $0x104] ss:$16 sps:$4 sm:$0xff]  }
  0x57   :  { %v1839_v39 = vld [vmem:[#allocation7 + $0xe8] ss:$16 sps:$4 sm:$0xff]   ;;  %v1847_v40 = vld [vmem:[#allocation7 + $0x10c] ss:$16 sps:$4 sm:$0xff]   ;;  %v1842_v41 = vld [vmem:[#allocation7 + $0x100] ss:$16 sps:$4 sm:$0xff]  }
  0x58   :  { %v1850_v42 = vld [vmem:[#allocation7 + $0x124] ss:$16 sps:$4 sm:$0xff]   ;;  %v1845_v43 = vld [vmem:[#allocation7 + $0x108] ss:$16 sps:$4 sm:$0xff]   ;;  %v1848_v44 = vld [vmem:[#allocation7 + $0x120] ss:$16 sps:$4 sm:$0xff]  }
  0x59   :  { %1018 = vmatpush1.bf16.msra.mxu0 %v1806_v17  ;;  %1100 = vmatpush1.bf16.msra.mxu1 %v1809_v19  ;;  %v1853_v45 = vld [vmem:[#allocation7 + $0x12c] ss:$16 sps:$4 sm:$0xff]   ;;  %v1851_v46 = vld [vmem:[#allocation7 + $0x128] ss:$16 sps:$4 sm:$0xff]   ;;  %v1856_v47 = vld [vmem:[#allocation7 + $0x144] ss:$16 sps:$4 sm:$0xff]  }
  0x5a   :  { %1019 = vmatprep.subr.bf16.mxu0 %v1814_v18  ;;  %1101 = vmatprep.subr.bf16.mxu1 %v1817_v20  ;;  %v1859_v48 = vld [vmem:[#allocation7 + $0x14c] ss:$16 sps:$4 sm:$0xff]   ;;  %v1854_v49 = vld [vmem:[#allocation7 + $0x140] ss:$16 sps:$4 sm:$0xff]   ;;  %v1862_v50 = vld [vmem:[#allocation7 + $0x164] ss:$16 sps:$4 sm:$0xff]  }
  0x5b   :  { %v1857_v51 = vld [vmem:[#allocation7 + $0x148] ss:$16 sps:$4 sm:$0xff]   ;;  %v1865_v52 = vld [vmem:[#allocation7 + $0x16c] ss:$16 sps:$4 sm:$0xff]   ;;  %v1860_v53 = vld [vmem:[#allocation7 + $0x160] ss:$16 sps:$4 sm:$0xff]  }
  0x5c   :  { %v1868_v54 = vld [vmem:[#allocation7 + $0x184] ss:$16 sps:$4 sm:$0xff]   ;;  %v1863_v55 = vld [vmem:[#allocation7 + $0x168] ss:$16 sps:$4 sm:$0xff]   ;;  %v1871_v56 = vld [vmem:[#allocation7 + $0x18c] ss:$16 sps:$4 sm:$0xff]  }
  0x5d   :  { %1020 = vmatpush1.bf16.msra.mxu0 %v1812_v21  ;;  %1102 = vmatpush1.bf16.msra.mxu1 %v1815_v23  ;;  %v1866_v57 = vld [vmem:[#allocation7 + $0x180] ss:$16 sps:$4 sm:$0xff]   ;;  %v1874_v58 = vld [vmem:[#allocation7 + $0x1a4] ss:$16 sps:$4 sm:$0xff]   ;;  %v1869_v59 = vld [vmem:[#allocation7 + $0x188] ss:$16 sps:$4 sm:$0xff]  }
  0x5e   :  { %1021 = vmatprep.subr.bf16.mxu0 %v1820_v22  ;;  %1103 = vmatprep.subr.bf16.mxu1 %v1823_v24  ;;  %v1877_v60 = vld [vmem:[#allocation7 + $0x1ac] ss:$16 sps:$4 sm:$0xff]   ;;  %v1872_v61 = vld [vmem:[#allocation7 + $0x1a0] ss:$16 sps:$4 sm:$0xff]   ;;  %v1875_v62 = vld [vmem:[#allocation7 + $0x1a8] ss:$16 sps:$4 sm:$0xff]  }
  0x5f   :  { %v1880_v63 = vld [vmem:[#allocation7 + $0x1c4] ss:$16 sps:$4 sm:$0xff]   ;;  %v1883_v0 = vld [vmem:[#allocation7 + $0x1cc] ss:$16 sps:$4 sm:$0xff]   ;;  %v1878_v1 = vld [vmem:[#allocation7 + $0x1c0] ss:$16 sps:$4 sm:$0xff]  }
  0x60   :  { %v1881_v2 = vld [vmem:[#allocation7 + $0x1c8] ss:$16 sps:$4 sm:$0xff]   ;;  %v1886_v3 = vld [vmem:[#allocation7 + $0x1e4] ss:$16 sps:$4 sm:$0xff]   ;;  %v1889_v4 = vld [vmem:[#allocation7 + $0x1ec] ss:$16 sps:$4 sm:$0xff]  }
  0x61   :  { %1022 = vmatpush1.bf16.msra.mxu0 %v1818_v25  ;;  %1104 = vmatpush1.bf16.msra.mxu1 %v1821_v27  ;;  %v1884_v5 = vld [vmem:[#allocation7 + $0x1e0] ss:$16 sps:$4 sm:$0xff]   ;;  %v1887_v6 = vld [vmem:[#allocation7 + $0x1e8] ss:$16 sps:$4 sm:$0xff]   ;;  %v1892_v7 = vld [vmem:[#allocation7 + $0x204] ss:$16 sps:$4 sm:$0xff]  }
  0x62   :  { %1023 = vmatprep.subr.bf16.mxu0 %v1826_v26  ;;  %1105 = vmatprep.subr.bf16.mxu1 %v1829_v28  ;;  %v1895_v8 = vld [vmem:[#allocation7 + $0x20c] ss:$16 sps:$4 sm:$0xff]   ;;  %v2244_v10 = vshrl.u32 %v89_v9, 7  ;;  %v2250_v12 = vld [vmem:[%s2298_s2] sm:$0xf] }
  0x63   :  { %v1952_v9 = vld [vmem:[#allocation7 + $0x344] ss:$16 sps:$4 sm:$0xff]  }
  0x64   :  { %v91_v11 = vsub.s32 0, %v2244_v10  ;;  %v95_v13 = vsub.s32 1, %v2244_v10  ;;  %v103_v14 = vsub.s32 3, %v2244_v10 }
  0x65   :  { %1024 = vmatpush1.bf16.msra.mxu0 %v1824_v29  ;;  %1106 = vmatpush1.bf16.msra.mxu1 %v1827_v31 }
  0x66   :  { %1025 = vmatprep.subr.bf16.mxu0 %v1832_v30  ;;  %1107 = vmatprep.subr.bf16.mxu1 %v1835_v32  ;;  %v92_v15 = vrot.slane %v2250_v12, %v91_v11  ;;  %v96_v16 = vrot.slane %v2250_v12, %v95_v13  ;;  %v104_v18 = vrot.slane %v2250_v12, %v103_v14  ;;  %v1890_v32 = vld [vmem:[#allocation7 + $0x200] ss:$16 sps:$4 sm:$0xff]  }
  0x69   :  { %1026 = vmatpush1.bf16.msra.mxu0 %v1830_v33  ;;  %1108 = vmatpush1.bf16.msra.mxu1 %v1833_v35  ;;  %v1893_v33 = vld [vmem:[#allocation7 + $0x208] ss:$16 sps:$4 sm:$0xff]  }
  0x6a   :  { %1027 = vmatprep.subr.bf16.mxu0 %v1838_v34  ;;  %1109 = vmatprep.subr.bf16.mxu1 %v1841_v36  ;;  %v1898_v36 = vld [vmem:[#allocation7 + $0x224] ss:$16 sps:$4 sm:$0xff]  }
  0x6d   :  { %1028 = vmatpush1.bf16.msra.mxu0 %v1836_v37  ;;  %1110 = vmatpush1.bf16.msra.mxu1 %v1839_v39  ;;  %v1901_v37 = vld [vmem:[#allocation7 + $0x22c] ss:$16 sps:$4 sm:$0xff]   ;;  %v1896_v39 = vld [vmem:[#allocation7 + $0x220] ss:$16 sps:$4 sm:$0xff]  }
  0x6e   :  { %1029 = vmatprep.subr.bf16.mxu0 %v1844_v38  ;;  %1111 = vmatprep.subr.bf16.mxu1 %v1847_v40  ;;  %v1899_v40 = vld [vmem:[#allocation7 + $0x228] ss:$16 sps:$4 sm:$0xff]  }
  0x71   :  { %1030 = vmatpush1.bf16.msra.mxu0 %v1842_v41  ;;  %1112 = vmatpush1.bf16.msra.mxu1 %v1845_v43  ;;  %v1904_v41 = vld [vmem:[#allocation7 + $0x244] ss:$16 sps:$4 sm:$0xff]   ;;  %v1902_v43 = vld [vmem:[#allocation7 + $0x240] ss:$16 sps:$4 sm:$0xff]  }
  0x72   :  { %1031 = vmatprep.subr.bf16.mxu0 %v1850_v42  ;;  %1113 = vmatprep.subr.bf16.mxu1 %v1853_v45  ;;  %v1907_v42 = vld [vmem:[#allocation7 + $0x24c] ss:$16 sps:$4 sm:$0xff]   ;;  %v1910_v45 = vld [vmem:[#allocation7 + $0x264] ss:$16 sps:$4 sm:$0xff]  }
  0x75   :  { %1032 = vmatpush1.bf16.msra.mxu0 %v1848_v44  ;;  %1114 = vmatpush1.bf16.msra.mxu1 %v1851_v46  ;;  %v1905_v44 = vld [vmem:[#allocation7 + $0x248] ss:$16 sps:$4 sm:$0xff]   ;;  %v1913_v46 = vld [vmem:[#allocation7 + $0x26c] ss:$16 sps:$4 sm:$0xff]  }
  0x76   :  { %1033 = vmatprep.subr.bf16.mxu0 %v1856_v47  ;;  %1115 = vmatprep.subr.bf16.mxu1 %v1859_v48  ;;  %v1908_v47 = vld [vmem:[#allocation7 + $0x260] ss:$16 sps:$4 sm:$0xff]   ;;  %v1911_v48 = vld [vmem:[#allocation7 + $0x268] ss:$16 sps:$4 sm:$0xff]  }
  0x79   :  { %1034 = vmatpush1.bf16.msra.mxu0 %v1854_v49  ;;  %1116 = vmatpush1.bf16.msra.mxu1 %v1857_v51  ;;  %v1916_v49 = vld [vmem:[#allocation7 + $0x284] ss:$16 sps:$4 sm:$0xff]   ;;  %v1914_v51 = vld [vmem:[#allocation7 + $0x280] ss:$16 sps:$4 sm:$0xff]  }
  0x7a   :  { %1035 = vmatprep.subr.bf16.mxu0 %v1862_v50  ;;  %1117 = vmatprep.subr.bf16.mxu1 %v1865_v52  ;;  %v1919_v50 = vld [vmem:[#allocation7 + $0x28c] ss:$16 sps:$4 sm:$0xff]   ;;  %v1917_v52 = vld [vmem:[#allocation7 + $0x288] ss:$16 sps:$4 sm:$0xff]  }
  0x7d   :  { %1036 = vmatpush1.bf16.msra.mxu0 %v1860_v53  ;;  %1118 = vmatpush1.bf16.msra.mxu1 %v1863_v55  ;;  %v1922_v53 = vld [vmem:[#allocation7 + $0x2a4] ss:$16 sps:$4 sm:$0xff]   ;;  %v1920_v55 = vld [vmem:[#allocation7 + $0x2a0] ss:$16 sps:$4 sm:$0xff]  }
  0x7e   :  { %1037 = vmatprep.subr.bf16.mxu0 %v1868_v54  ;;  %1119 = vmatprep.subr.bf16.mxu1 %v1871_v56  ;;  %v1925_v54 = vld [vmem:[#allocation7 + $0x2ac] ss:$16 sps:$4 sm:$0xff]   ;;  %v1923_v56 = vld [vmem:[#allocation7 + $0x2a8] ss:$16 sps:$4 sm:$0xff]  }
  0x81   :  { %1038 = vmatpush1.bf16.msra.mxu0 %v1866_v57  ;;  %1120 = vmatpush1.bf16.msra.mxu1 %v1869_v59  ;;  %v1928_v57 = vld [vmem:[#allocation7 + $0x2c4] ss:$16 sps:$4 sm:$0xff]   ;;  %v1926_v59 = vld [vmem:[#allocation7 + $0x2c0] ss:$16 sps:$4 sm:$0xff]  }
  0x82   :  { %1039 = vmatprep.subr.bf16.mxu0 %v1874_v58  ;;  %1121 = vmatprep.subr.bf16.mxu1 %v1877_v60  ;;  %v1931_v58 = vld [vmem:[#allocation7 + $0x2cc] ss:$16 sps:$4 sm:$0xff]   ;;  %v1929_v60 = vld [vmem:[#allocation7 + $0x2c8] ss:$16 sps:$4 sm:$0xff]  }
  0x85   :  { %1040 = vmatpush1.bf16.msra.mxu0 %v1872_v61  ;;  %1122 = vmatpush1.bf16.msra.mxu1 %v1875_v62  ;;  %v1934_v61 = vld [vmem:[#allocation7 + $0x2e4] ss:$16 sps:$4 sm:$0xff]   ;;  %v1937_v62 = vld [vmem:[#allocation7 + $0x2ec] ss:$16 sps:$4 sm:$0xff]  }
  0x86   :  { %1041 = vmatprep.subr.bf16.mxu0 %v1880_v63  ;;  %1123 = vmatprep.subr.bf16.mxu1 %v1883_v0  ;;  %v1932_v63 = vld [vmem:[#allocation7 + $0x2e0] ss:$16 sps:$4 sm:$0xff]   ;;  %v1935_v0 = vld [vmem:[#allocation7 + $0x2e8] ss:$16 sps:$4 sm:$0xff]  }
  0x89   :  { %1042 = vmatpush1.bf16.msra.mxu0 %v1878_v1  ;;  %1124 = vmatpush1.bf16.msra.mxu1 %v1881_v2  ;;  %v1940_v1 = vld [vmem:[#allocation7 + $0x304] ss:$16 sps:$4 sm:$0xff]   ;;  %v1943_v2 = vld [vmem:[#allocation7 + $0x30c] ss:$16 sps:$4 sm:$0xff]  }
  0x8a   :  { %1043 = vmatprep.subr.bf16.mxu0 %v1886_v3  ;;  %1125 = vmatprep.subr.bf16.mxu1 %v1889_v4  ;;  %v1938_v3 = vld [vmem:[#allocation7 + $0x300] ss:$16 sps:$4 sm:$0xff]   ;;  %v1941_v4 = vld [vmem:[#allocation7 + $0x308] ss:$16 sps:$4 sm:$0xff]  }
  0x8d   :  { %1044 = vmatpush1.bf16.msra.mxu0 %v1884_v5  ;;  %1126 = vmatpush1.bf16.msra.mxu1 %v1887_v6  ;;  %v1946_v5 = vld [vmem:[#allocation7 + $0x324] ss:$16 sps:$4 sm:$0xff]   ;;  %v1949_v6 = vld [vmem:[#allocation7 + $0x32c] ss:$16 sps:$4 sm:$0xff]  }
  0x8e   :  { %1054 = vmatprep.subr.bf16.mxu0 %v1892_v7  ;;  %1136 = vmatprep.subr.bf16.mxu1 %v1895_v8  ;;  %v1944_v7 = vld [vmem:[#allocation7 + $0x320] ss:$16 sps:$4 sm:$0xff]   ;;  %v1947_v8 = vld [vmem:[#allocation7 + $0x328] ss:$16 sps:$4 sm:$0xff]  }
 0x123   :  { %v167_v17 = vpop.f32.mrb[0].mxu0  ;;  %v2263_v23 = vpop.f32.mrb[0].mxu1 }
 0x124   :  { %v168_v19 = vadd.f32 %v167_v17, %v92_v15  ;;  %v169_v20 = vpop.f32.mrb[1].mxu0  ;;  %v210_v26 = vpop.f32.mrb[1].mxu1  ;;  %v1955_v15 = vld [vmem:[#allocation7 + $0x34c] ss:$16 sps:$4 sm:$0xff]   ;;  %v1953_v17 = vld [vmem:[#allocation7 + $0x348] ss:$16 sps:$4 sm:$0xff]  }
 0x125   :  { %v170_v21 = vadd.f32 %v169_v20, %v96_v16  ;;  %v171_v22 = vpop.f32.mrb[2].mxu0  ;;  %v211_v28 = vadd.f32 %v210_v26, %v104_v18  ;;  %v212_v29 = vpop.f32.mrb[2].mxu1  ;;  %v1950_v16 = vld [vmem:[#allocation7 + $0x340] ss:$16 sps:$4 sm:$0xff]   ;;  %v1958_v18 = vld [vmem:[#allocation7 + $0x364] ss:$16 sps:$4 sm:$0xff]  }
 0x126   :  { %v215_v24 = vmax.f32 %v168_v19, 0.0  ;;  %v172_v25 = vpop.f32.mrb[3].mxu0  ;;  %v213_v30 = vpop.f32.mrb[3].mxu1  ;;  %v1961_v19 = vld [vmem:[#allocation7 + $0x36c] ss:$16 sps:$4 sm:$0xff]  }
 0x127   :  { %v216_v27 = vmax.f32 %v170_v21, 0.0  ;;  %v218_v34 = vmax.f32 %v211_v28, 0.0  ;;  %v1956_v20 = vld [vmem:[#allocation7 + $0x360] ss:$16 sps:$4 sm:$0xff]   ;;  %v1959_v21 = vld [vmem:[#allocation7 + $0x368] ss:$16 sps:$4 sm:$0xff]  }
 0x128   :  { %v219_v35 = vpack.c.bf16 %v215_v24, %v215_v24  ;;  %v1964_v22 = vld [vmem:[#allocation7 + $0x384] ss:$16 sps:$4 sm:$0xff]   ;;  %v1967_v24 = vld [vmem:[#allocation7 + $0x38c] ss:$16 sps:$4 sm:$0xff]   ;;  %v1962_v25 = vld [vmem:[#allocation7 + $0x380] ss:$16 sps:$4 sm:$0xff]  }
 0x129   :  { %v220_v31 = vpack.c.bf16 %v216_v27, %v216_v27  ;;  %v222_v38 = vpack.c.bf16 %v218_v34, %v218_v34  ;;  %v1965_v26 = vld [vmem:[#allocation7 + $0x388] ss:$16 sps:$4 sm:$0xff]   ;;  %v99_v27 = vsub.s32 2, %v2244_v10  ;;  %v1970_v28 = vld [vmem:[#allocation7 + $0x3a4] ss:$16 sps:$4 sm:$0xff]  }
 0x12a   :  { %v1973_v29 = vld [vmem:[#allocation7 + $0x3ac] ss:$16 sps:$4 sm:$0xff]   ;;  %v1968_v30 = vld [vmem:[#allocation7 + $0x3a0] ss:$16 sps:$4 sm:$0xff]  }
 0x12b   :  { %1045 = vmatprep.mubr.bf16.mxu0 %v220_v31  ;;  %1127 = vmatprep.mubr.bf16.mxu1 %v220_v31  ;;  %v1971_v31 = vld [vmem:[#allocation7 + $0x3a8] ss:$16 sps:$4 sm:$0xff]   ;;  %v1979_v34 = vld [vmem:[#allocation7 + $0x3cc] ss:$16 sps:$4 sm:$0xff]  }
 0x12c   :  { %1046 = vmatmul.mubr.bf16.vlgmr.msra.gmra.mrb[4].mxu0 %v219_v35  ;;  %1128 = vmatmul.mubr.bf16.vlgmr.msra.gmra.mrb[4].mxu1 %v219_v35  ;;  %v1974_v35 = vld [vmem:[#allocation7 + $0x3c0] ss:$16 sps:$4 sm:$0xff]  }
 0x12d   :  { %1055 = vmatpush1.bf16.msra.mxu0 %v1890_v32  ;;  %1137 = vmatpush1.bf16.msra.mxu1 %v1893_v33  ;;  %v100_v32 = vrot.slane %v2250_v12, %v99_v27  ;;  %v1976_v33 = vld [vmem:[#allocation7 + $0x3c4] ss:$16 sps:$4 sm:$0xff]  }
 0x12e   :  { %1056 = vmatprep.subr.bf16.mxu0 %v1898_v36  ;;  %1138 = vmatprep.subr.bf16.mxu1 %v1901_v37  ;;  %v1977_v36 = vld [vmem:[#allocation7 + $0x3c8] ss:$16 sps:$4 sm:$0xff]   ;;  %v1986_v12 = vld [vmem:[#allocation8 + $0x40] sm:$0xff]  }
 0x12f   :  { %1086 = vmatprep.mubr.bf16.mxu0 %v222_v38  ;;  %1168 = vmatprep.mubr.bf16.mxu1 %v222_v38  ;;  %v209_v37 = vadd.f32 %v2263_v23, %v100_v32  ;;  %v1982_v38 = vld [vmem:[#allocation7 + $0x3e4] ss:$16 sps:$4 sm:$0xff]   ;;  %v1990_v23 = vld [vmem:[#allocation8 + $0x48] sm:$0xff]  }
 0x131   :  { %1057 = vmatpush1.bf16.msra.mxu0 %v1896_v39  ;;  %1139 = vmatpush1.bf16.msra.mxu1 %v1899_v40  ;;  %v1985_v39 = vld [vmem:[#allocation7 + $0x3ec] ss:$16 sps:$4 sm:$0xff]   ;;  %v1980_v40 = vld [vmem:[#allocation7 + $0x3e0] ss:$16 sps:$4 sm:$0xff]  }
 0x132   :  { %1058 = vmatprep.subr.bf16.mxu0 %v1904_v41  ;;  %1140 = vmatprep.subr.bf16.mxu1 %v1907_v42  ;;  %v1983_v41 = vld [vmem:[#allocation7 + $0x3e8] ss:$16 sps:$4 sm:$0xff]   ;;  %v217_v42 = vmax.f32 %v209_v37, 0.0 }
 0x135   :  { %1059 = vmatpush1.bf16.msra.mxu0 %v1902_v43  ;;  %1141 = vmatpush1.bf16.msra.mxu1 %v1905_v44  ;;  %v1987_v43 = vld [vmem:[#allocation8 + $0xc0] sm:$0xff]  }
 0x136   :  { %1060 = vmatprep.subr.bf16.mxu0 %v1910_v45  ;;  %1142 = vmatprep.subr.bf16.mxu1 %v1913_v46  ;;  %v1988_v44 = vld [vmem:[#allocation8] sm:$0xff]   ;;  %v221_v46 = vpack.c.bf16 %v217_v42, %v217_v42 }
 0x137   :  { %v1989_v45 = vld [vmem:[#allocation8 + $0x80] sm:$0xff]  }
 0x139   :  { %1061 = vmatpush1.bf16.msra.mxu0 %v1908_v47  ;;  %1143 = vmatpush1.bf16.msra.mxu1 %v1911_v48  ;;  %v1991_v47 = vld [vmem:[#allocation8 + $0xc8] sm:$0xff]  }
 0x13a   :  { %1062 = vmatprep.subr.bf16.mxu0 %v1916_v49  ;;  %1144 = vmatprep.subr.bf16.mxu1 %v1919_v50  ;;  %v1992_v48 = vld [vmem:[#allocation8 + $0x8] sm:$0xff]   ;;  %v1994_v50 = vld [vmem:[#allocation8 + $0x50] sm:$0xff]  }
 0x13b   :  { %v1993_v49 = vld [vmem:[#allocation8 + $0x88] sm:$0xff]  }
 0x13d   :  { %1063 = vmatpush1.bf16.msra.mxu0 %v1914_v51  ;;  %1145 = vmatpush1.bf16.msra.mxu1 %v1917_v52  ;;  %v1995_v51 = vld [vmem:[#allocation8 + $0xd0] sm:$0xff]  }
 0x13e   :  { %1064 = vmatprep.subr.bf16.mxu0 %v1922_v53  ;;  %1146 = vmatprep.subr.bf16.mxu1 %v1925_v54  ;;  %v1996_v52 = vld [vmem:[#allocation8 + $0x10] sm:$0xff]   ;;  %v1998_v54 = vld [vmem:[#allocation8 + $0x58] sm:$0xff]  }
 0x13f   :  { %v1997_v53 = vld [vmem:[#allocation8 + $0x90] sm:$0xff]  }
 0x141   :  { %1065 = vmatpush1.bf16.msra.mxu0 %v1920_v55  ;;  %1147 = vmatpush1.bf16.msra.mxu1 %v1923_v56  ;;  %v1999_v55 = vld [vmem:[#allocation8 + $0xd8] sm:$0xff]  }
 0x142   :  { %1066 = vmatprep.subr.bf16.mxu0 %v1928_v57  ;;  %1148 = vmatprep.subr.bf16.mxu1 %v1931_v58  ;;  %v2000_v56 = vld [vmem:[#allocation8 + $0x18] sm:$0xff]   ;;  %v2002_v58 = vld [vmem:[#allocation8 + $0x60] sm:$0xff]  }
 0x143   :  { %v2001_v57 = vld [vmem:[#allocation8 + $0x98] sm:$0xff]  }
 0x145   :  { %1067 = vmatpush1.bf16.msra.mxu0 %v1926_v59  ;;  %1149 = vmatpush1.bf16.msra.mxu1 %v1929_v60  ;;  %v2003_v59 = vld [vmem:[#allocation8 + $0xe0] sm:$0xff]  }
 0x146   :  { %1068 = vmatprep.subr.bf16.mxu0 %v1934_v61  ;;  %1150 = vmatprep.subr.bf16.mxu1 %v1937_v62  ;;  %v2004_v60 = vld [vmem:[#allocation8 + $0x20] sm:$0xff]   ;;  %v2006_v62 = vld [vmem:[#allocation8 + $0x68] sm:$0xff]  }
 0x147   :  { %v2005_v61 = vld [vmem:[#allocation8 + $0xa0] sm:$0xff]  }
 0x149   :  { %1069 = vmatpush1.bf16.msra.mxu0 %v1932_v63  ;;  %1151 = vmatpush1.bf16.msra.mxu1 %v1935_v0  ;;  %v2007_v63 = vld [vmem:[#allocation8 + $0xe8] sm:$0xff]  }
 0x14a   :  { %1070 = vmatprep.subr.bf16.mxu0 %v1940_v1  ;;  %1152 = vmatprep.subr.bf16.mxu1 %v1943_v2  ;;  %v2008_v0 = vld [vmem:[#allocation8 + $0x28] sm:$0xff]   ;;  %v2010_v2 = vld [vmem:[#allocation8 + $0x70] sm:$0xff]  }
 0x14b   :  { %v2009_v1 = vld [vmem:[#allocation8 + $0xa8] sm:$0xff]  }
 0x14d   :  { %1071 = vmatpush1.bf16.msra.mxu0 %v1938_v3  ;;  %1153 = vmatpush1.bf16.msra.mxu1 %v1941_v4  ;;  %v2011_v3 = vld [vmem:[#allocation8 + $0xf0] sm:$0xff]  }
 0x14e   :  { %1072 = vmatprep.subr.bf16.mxu0 %v1946_v5  ;;  %1154 = vmatprep.subr.bf16.mxu1 %v1949_v6  ;;  %v2012_v4 = vld [vmem:[#allocation8 + $0x30] sm:$0xff]   ;;  %v2014_v6 = vld [vmem:[#allocation8 + $0x78] sm:$0xff]  }
 0x14f   :  { %v2013_v5 = vld [vmem:[#allocation8 + $0xb0] sm:$0xff]  }
 0x151   :  { %1073 = vmatpush1.bf16.msra.mxu0 %v1944_v7  ;;  %1155 = vmatpush1.bf16.msra.mxu1 %v1947_v8  ;;  %v2015_v7 = vld [vmem:[#allocation8 + $0xf8] sm:$0xff]  }
 0x152   :  { %1074 = vmatprep.subr.bf16.mxu0 %v1952_v9  ;;  %1156 = vmatprep.subr.bf16.mxu1 %v1955_v15  ;;  %v2016_v8 = vld [vmem:[#allocation8 + $0x38] sm:$0xff]  }
 0x153   :  { %v2017_v9 = vld [vmem:[#allocation8 + $0xb8] sm:$0xff]  }
 0x154   :  { %v351_v15 = vld [vmem:[%s2300_s4] sm:$0xf] }
 0x155   :  { %1075 = vmatpush1.bf16.msra.mxu0 %v1950_v16  ;;  %1157 = vmatpush1.bf16.msra.mxu1 %v1953_v17  ;;  %v356_v16 = vrot.slane %v351_v15, %v91_v11  ;;  %v364_v17 = vrot.slane %v351_v15, %v99_v27 }
 0x156   :  { %1076 = vmatprep.subr.bf16.mxu0 %v1958_v18  ;;  %1158 = vmatprep.subr.bf16.mxu1 %v1961_v19  ;;  %v360_v18 = vrot.slane %v351_v15, %v95_v13  ;;  %v368_v19 = vrot.slane %v351_v15, %v103_v14 }
 0x159   :  { %1077 = vmatpush1.bf16.msra.mxu0 %v1956_v20  ;;  %1159 = vmatpush1.bf16.msra.mxu1 %v1959_v21 }
 0x15a   :  { %1078 = vmatprep.subr.bf16.mxu0 %v1964_v22  ;;  %1160 = vmatprep.subr.bf16.mxu1 %v1967_v24 }
 0x15d   :  { %1079 = vmatpush1.bf16.msra.mxu0 %v1962_v25  ;;  %1161 = vmatpush1.bf16.msra.mxu1 %v1965_v26 }
 0x15e   :  { %1080 = vmatprep.subr.bf16.mxu0 %v1970_v28  ;;  %1162 = vmatprep.subr.bf16.mxu1 %v1973_v29 }
 0x161   :  { %1081 = vmatpush1.bf16.msra.mxu0 %v1968_v30  ;;  %1163 = vmatpush1.bf16.msra.mxu1 %v1971_v31 }
 0x162   :  { %1082 = vmatprep.subr.bf16.mxu0 %v1976_v33  ;;  %1164 = vmatprep.subr.bf16.mxu1 %v1979_v34 }
 0x165   :  { %1083 = vmatpush1.bf16.msra.mxu0 %v1974_v35  ;;  %1165 = vmatpush1.bf16.msra.mxu1 %v1977_v36 }
 0x166   :  { %1084 = vmatprep.subr.bf16.mxu0 %v1982_v38  ;;  %1166 = vmatprep.subr.bf16.mxu1 %v1985_v39  ;;  %v1689_v39 = vld [vmem:[%s2302_s6] ss:$0 sm:$0xff]  ;;  %s2149_s6 = smov [#allocation10]  }
 0x167   :  { %s1544_s29 = sshll.u32 %s2149_s6, 4  ;;  %s1545_s29 = int_to_ptr.vmem [resolvable:$true] %s1544_s29 }
 0x168   :  { %s2110_s30 = scalar_lea.vmem %s1545_s29, 128  ;;  %p2115_p5 = scmp.lt.s32.totalorder %s1545_s29, %s1545_s29 }
 0x169   :  { %1085 = vmatpush1.bf16.msra.mxu0 %v1980_v40  ;;  %1167 = vmatpush1.bf16.msra.mxu1 %v1983_v41  ;;  %p2111_p4 = scmp.ne.s32.totalorder %s1545_s29, %s2110_s30  ;;  %p2116_p6 = scmp.lt.s32.totalorder %s2110_s30, %s2110_s30 }
 0x16a   :  { %1722 = vmatprep.subr.bf16.mxu0 %v1986_v12  ;;  %1744 = vmatprep.subr.bf16.mxu1 %v1987_v43 }
 0x16b   :  { %p2117_p7 = por %p2116_p6, %p2115_p5 }
 0x16c   :  { %1087 = vmatmul.mubr.bf16.vlgmr.msra.gmra.mrb[4].mxu0 %v221_v46  ;;  %1169 = vmatmul.mubr.bf16.vlgmr.msra.gmra.mrb[4].mxu1 %v221_v46 }
 0x16d   :  { %1723 = vmatpush3.bf16.msra.mxu0 %v1988_v44  ;;  %1745 = vmatpush3.bf16.msra.mxu1 %v1989_v45  ;;  %p2118_p8 = pnand %p2117_p7, %p2111_p4 }
 0x16e   :  { %1724 = vmatprep.subr.bf16.mxu0 %v1990_v23  ;;  %1746 = vmatprep.subr.bf16.mxu1 %v1991_v47 }
 0x171   :  { %1725 = vmatpush3.bf16.msra.mxu0 %v1992_v48  ;;  %1747 = vmatpush3.bf16.msra.mxu1 %v1993_v49 }
 0x172   :  { %1726 = vmatprep.subr.bf16.mxu0 %v1994_v50  ;;  %1748 = vmatprep.subr.bf16.mxu1 %v1995_v51 }
 0x175   :  { %1727 = vmatpush3.bf16.msra.mxu0 %v1996_v52  ;;  %1749 = vmatpush3.bf16.msra.mxu1 %v1997_v53 }
 0x176   :  { %1728 = vmatprep.subr.bf16.mxu0 %v1998_v54  ;;  %1750 = vmatprep.subr.bf16.mxu1 %v1999_v55 }
 0x179   :  { %1729 = vmatpush3.bf16.msra.mxu0 %v2000_v56  ;;  %1751 = vmatpush3.bf16.msra.mxu1 %v2001_v57 }
 0x17a   :  { %1730 = vmatprep.subr.bf16.mxu0 %v2002_v58  ;;  %1752 = vmatprep.subr.bf16.mxu1 %v2003_v59 }
 0x17d   :  { %1731 = vmatpush3.bf16.msra.mxu0 %v2004_v60  ;;  %1753 = vmatpush3.bf16.msra.mxu1 %v2005_v61 }
 0x17e   :  { %1732 = vmatprep.subr.bf16.mxu0 %v2006_v62  ;;  %1754 = vmatprep.subr.bf16.mxu1 %v2007_v63 }
 0x181   :  { %1733 = vmatpush3.bf16.msra.mxu0 %v2008_v0  ;;  %1755 = vmatpush3.bf16.msra.mxu1 %v2009_v1 }
 0x182   :  { %1734 = vmatprep.subr.bf16.mxu0 %v2010_v2  ;;  %1756 = vmatprep.subr.bf16.mxu1 %v2011_v3 }
 0x185   :  { %1735 = vmatpush3.bf16.msra.mxu0 %v2012_v4  ;;  %1757 = vmatpush3.bf16.msra.mxu1 %v2013_v5 }
 0x186   :  { %1736 = vmatprep.subr.bf16.mxu0 %v2014_v6  ;;  %1758 = vmatprep.subr.bf16.mxu1 %v2015_v7 }
 0x189   :  { %1737 = vmatpush3.bf16.msra.mxu0 %v2016_v8  ;;  %1759 = vmatpush3.bf16.msra.mxu1 %v2017_v9 }
 0x23f   :  { %v1088_v20 = vpop.f32.mrb[4].mxu0  ;;  %v1170_v21 = vpop.f32.mrb[4].mxu1 }
 0x240   :  { %v1766_v22 = vadd.f32 %v1088_v20, %v356_v16  ;;  %v1768_v24 = vadd.f32 %v1170_v21, %v364_v17  ;;  %v1090_v25 = vpop.f32.mrb[5].mxu0  ;;  %v1172_v26 = vpop.f32.mrb[5].mxu1 }
 0x241   :  { %v1767_v28 = vadd.f32 %v1090_v25, %v360_v18  ;;  %v1769_v29 = vadd.f32 %v1172_v26, %v368_v19  ;;  %v1092_v30 = vpop.f32.mrb[6].mxu0  ;;  %v1174_v31 = vpop.f32.mrb[6].mxu1 }
 0x242   :  { %v1177_v11 = vmax.f32 %v1766_v22, 0.0  ;;  %v1179_v32 = vmax.f32 %v1768_v24, 0.0  ;;  %v1093_v33 = vpop.f32.mrb[7].mxu0  ;;  %v1175_v27 = vpop.f32.mrb[7].mxu1 }
 0x243   :  { %v1178_v34 = vmax.f32 %v1767_v28, 0.0  ;;  %v1180_v35 = vmax.f32 %v1769_v29, 0.0 }
 0x244   :  { %v1181_v10 = vpack.c.bf16 %v1177_v11, %v1177_v11  ;;  %v1183_v14 = vpack.c.bf16 %v1179_v32, %v1179_v32 }
 0x245   :  { %v1182_v13 = vpack.c.bf16 %v1178_v34, %v1178_v34  ;;  %v1184_v36 = vpack.c.bf16 %v1180_v35, %v1180_v35 }
 0x247   :  { %1480 = vmatprep.mubr.bf16.mxu0 %v1182_v13  ;;  %1520 = vmatprep.mubr.bf16.mxu1 %v1184_v36 }
 0x248   :  { %1481 = vmatmul.mubr.bf16.vlgmr.msra.gmra.mrb[8].mxu0 %v1181_v10  ;;  %1521 = vmatmul.mubr.bf16.vlgmr.msra.gmra.mrb[8].mxu1 %v1183_v14 }
 0x31b   :  { %v1738_v37 = vpop.f32.mrb[8].mxu0  ;;  %v1760_v38 = vpop.f32.mrb[8].mxu1 }
 0x31c   :  { %v1739_v40 = vpop.f32.mrb[9].mxu0  ;;  %v1761_v41 = vpop.f32.mrb[9].mxu1 }
 0x31d   :  { %v1740_v42 = vadd.f32 %v1739_v40, %v1738_v37  ;;  %v1762_v12 = vadd.f32 %v1761_v41, %v1760_v38  ;;  %v1741_v43 = vpop.f32.mrb[10].mxu0  ;;  %v1763_v44 = vpop.f32.mrb[10].mxu1 }
 0x31e   :  { %v1742_v45 = vpop.f32.mrb[11].mxu0  ;;  %v1764_v46 = vpop.f32.mrb[11].mxu1 }
 0x31f   :  { %v1483_v23 = vadd.f32 %v1740_v42, %v1689_v39 }
 0x321   :  { %v1523_v47 = vadd.f32 %v1762_v12, %v1483_v23 }
 0x323   :  { %1528 = vmax.xlane.f32.xlu0 %v1523_v47 }
 0x3b0   :  { %v1529_v48 = vpop.xlane.xlu0 %1528 }
 0x3b1   :  { %v1530_v49 = vsub.f32 %v1523_v47, %v1529_v48 }
 0x3b3   :  { %v1531_v50 = vmul.f32 1.442695, %v1530_v49 }
 0x3b5   :  { %2018 = vpow2.f32 %v1531_v50 }
 0x3bf   :  { %v2019_v51 = vpop.eup %2018 }
 0x3c0   :  { %1533 = vadd.xlane.f32.xlu0 %v2019_v51 }
 0x44d   :  { %v1534_v52 = vpop.xlane.xlu0 %1533 }
 0x44e   :  { %2020 = vrcp.f32 %v1534_v52 }
 0x458   :  { %v2021_v53 = vpop.eup %2020 }
 0x459   :  { %v1536_v54 = vmul.f32 %v2021_v53, %v2019_v51 }
 0x45b   :  { %1537 = vst [vmem:[#allocation10] sm:$0xff] %v1536_v54 }
 0x45c   :  { %2121 = shalt.err (!%p2118_p8)
}
 0x45d   :  { %s2122_s10 = scalar_lea.hbm %s2303_s7, 128 }
 0x45e   :  { %p2123_p9 = scmp.ne.s32.totalorder %s2303_s7, %s2122_s10  ;;  %p2126_p10 = scmp.lt.u32.totalorder %s2122_s10, %s2303_s7 }
 0x460   :  { %p2128_p11 = pnand %p2126_p10, %p2123_p9 }
 0x462   :  { %2131 = shalt.err (!%p2128_p11)
}
 0x463   :  { %1547 = dma.vmem_to_hbm [thread:$0]  %s1545_s29, 128, %s2303_s7, [#allocation4]  }
 0x464   :  { %2138 = dma.done.wait [#allocation4], 128  }
 0x465   :  { %2139 = vsyncadd [#allocation4], 4294967168 }
 0x466   :  { %1551 = vsyncpa [#allocation3], 1 }
 0x467   :  { %1552 = vsyncpa [#allocation6], 1 }
 0x468   :  { %1553 = vsyncpa [#allocation9], 1 }
 0x469   :  { %1554 = vsyncpa [#allocation4], 1 }

</bundles_post_ra>
